<compile_context>
chip_gen: v6e
topology: v6e:2x2x1
jax: 0.10.0
libtpu: 0.0.40
codegen_flags: <defaults>
</compile_context>

<pallas_src>
import functools

import jax
import jax.numpy as jnp
import numpy as np
from jax.experimental import pallas as pl
from jax.experimental.pallas import tpu as pltpu

EPS = 1e-5

# f32/HIGHEST matmul precision is kept on purpose: the two BatchNorms
# renormalize to unit scale, so bf16 MXU inputs (DEFAULT precision) leave
# several-times-1e-3 relative error on the softmax output and would break the
# 1e-3 check below.  MXU work is < 1 MFLOP/sample here, so this costs nothing;
# flip to Precision.DEFAULT for the v5e bf16 path if a looser tolerance is OK.
MXU_PRECISION = jax.lax.Precision.HIGHEST

POOL_ROWS = 49       # 7*7 spatial positions fed to the global max-pool
POOL_ROWS_PAD = 56   # padded to a multiple of 8 (sublane tile) per sample


# ------------------------------ small helpers -------------------------------

def _vmem_limit_bytes(shapes, itemsize=4):
    """Sum of sublane/lane padded f32 tile sizes, doubled for pipeline
    buffering, plus headroom; clipped well below v7x's 64 MiB physical VMEM."""
    total = 0
    for shp in shapes:
        rows = 1
        for d in shp[:-1]:
            rows *= d
        rows = -(-rows // 8) * 8
        cols = -(-shp[-1] // 128) * 128
        total += rows * cols * itemsize
    return min(48 * 1024 * 1024, 2 * total + 16 * 1024 * 1024)


# ------------------------------ Pallas kernels -------------------------------

def _conv1_bn_relu_kernel(p_ref, w_ref, g_ref, b_ref, o_ref):
    # p: (9, M)  w: (16, 9)  g/b: (16, 1)  o: (16, M);  lane axis = M (dense).
    conv = jnp.dot(w_ref[...], p_ref[...],
                   preferred_element_type=jnp.float32, precision=MXU_PRECISION)
    mean = jnp.mean(conv, axis=1, keepdims=True)                 # per channel
    var = jnp.mean((conv - mean) ** 2, axis=1, keepdims=True)    # biased (train)
    y = (conv - mean) * jax.lax.rsqrt(var + EPS) * g_ref[...] + b_ref[...]
    o_ref[...] = jnp.maximum(y, 0.0)


def _head_kernel(p_ref, w_ref, g_ref, b_ref, wl_ref, bl_ref, o_ref,
                 *, batch, rows_pad, rows_valid):
    # p: (batch*rows_pad, 144)  w: (144, 32)  g/b: (1, 32)
    # wl: (32, 10)  bl: (1, 10)  o: (batch, 10)
    conv = jnp.dot(p_ref[...], w_ref[...],
                   preferred_element_type=jnp.float32, precision=MXU_PRECISION)

    # BatchNorm (train mode) over the batch*49 valid rows.  Zero pad rows
    # contribute exactly 0 to both sums, so only the divisor uses the true count.
    cnt = float(batch * rows_valid)
    mean = jnp.sum(conv, axis=0, keepdims=True) / cnt
    var = jnp.sum(conv * conv, axis=0, keepdims=True) / cnt - mean * mean
    y = (conv - mean) * jax.lax.rsqrt(var + EPS) * g_ref[...] + b_ref[...]
    y = jnp.maximum(y, 0.0)                              # (batch*rows_pad, 32)

    # Global 7x7 max-pool: tile-aligned reshape (rows_pad is a multiple of 8),
    # mask out pad rows (ReLU guarantees the true max is >= 0, so 0 is exact).
    y = y.reshape(batch, rows_pad, y.shape[-1])
    row_id = jax.lax.broadcasted_iota(jnp.int32, y.shape, 1)
    pooled = jnp.max(jnp.where(row_id < rows_valid, y, 0.0), axis=1)  # (batch, 32)

    logits = jnp.dot(pooled, wl_ref[...],
                     preferred_element_type=jnp.float32,
                     precision=MXU_PRECISION) + bl_ref[...]
    m = jnp.max(logits, axis=1, keepdims=True)
    e = jnp.exp(logits - m)
    # Softmax denominator via the approximate EUP reciprocal (free VLIW slot).
    o_ref[...] = e * pl.reciprocal(jnp.sum(e, axis=1, keepdims=True), approx=True)
    # NOTE: the (batch, 10) output is lane-padded to 128; at 40 B/sample the
    # masked store is irrelevant.


# ------------------------------ pallas wrappers ------------------------------

def conv1_bn_relu(p1t, w1m, g1, b1):
    k, m = p1t.shape                 # (9, N*196)
    cout = w1m.shape[0]              # 16
    vmem = _vmem_limit_bytes([(k, m), (cout, k), (cout, 1), (cout, 1), (cout, m)])
    return pl.pallas_call(
        _conv1_bn_relu_kernel,
        out_shape=jax.ShapeDtypeStruct((cout, m), jnp.float32),
        grid=(1,),
        in_specs=[
            pl.BlockSpec((k, m), lambda i: (0, 0)),
            pl.BlockSpec((cout, k), lambda i: (0, 0)),
            pl.BlockSpec((cout, 1), lambda i: (0, 0)),
            pl.BlockSpec((cout, 1), lambda i: (0, 0)),
        ],
        out_specs=pl.BlockSpec((cout, m), lambda i: (0, 0)),
        compiler_params=pltpu.CompilerParams(
            dimension_semantics=("arbitrary",), vmem_limit_bytes=vmem),
    )(p1t, w1m, g1.reshape(cout, 1), b1.reshape(cout, 1))


def head(p2, w2m, g2, b2, wlt, bl, batch):
    rows, kf = p2.shape              # (N*56, 144)
    cout = w2m.shape[1]              # 32
    ncls = wlt.shape[1]              # 10
    kern = functools.partial(_head_kernel, batch=batch,
                             rows_pad=rows // batch, rows_valid=POOL_ROWS)
    vmem = _vmem_limit_bytes([(rows, kf), (kf, cout), (1, cout), (1, cout),
                              (cout, ncls), (1, ncls), (rows, cout),
                              (batch, ncls)])
    return pl.pallas_call(
        kern,
        out_shape=jax.ShapeDtypeStruct((batch, ncls), jnp.float32),
        grid=(1,),
        in_specs=[
            pl.BlockSpec((rows, kf), lambda i: (0, 0)),
            pl.BlockSpec((kf, cout), lambda i: (0, 0)),
            pl.BlockSpec((1, cout), lambda i: (0, 0)),
            pl.BlockSpec((1, cout), lambda i: (0, 0)),
            pl.BlockSpec((cout, ncls), lambda i: (0, 0)),
            pl.BlockSpec((1, ncls), lambda i: (0, 0)),
        ],
        out_specs=pl.BlockSpec((batch, ncls), lambda i: (0, 0)),
        compiler_params=pltpu.CompilerParams(
            dimension_semantics=("arbitrary",), vmem_limit_bytes=vmem),
    )(p2, w2m, g2.reshape(1, cout), b2.reshape(1, cout), wlt, bl.reshape(1, ncls))


# ------------------------------- full forward --------------------------------

def encoder_forward(x_nchw, params):
    n, _, h, w = x_nchw.shape
    x = x_nchw.reshape(n, h, w)                                # Cin == 1
    h1, w1 = h // 2, w // 2                                    # 14, 14

    # conv1 patches, TRANSPOSED: (9, N*14*14) so lanes run along N*H*W.
    xp = jnp.pad(x, ((0, 0), (1, 1), (1, 1)))
    cols = [xp[:, ky:ky + h:2, kx:kx + w:2]
            for ky in range(3) for kx in range(3)]             # 9 x (N,14,14)
    p1t = jnp.stack(cols, axis=0).reshape(9, n * h1 * w1)
    y1t = conv1_bn_relu(p1t, params['w1m'], params['g1'], params['b1'])  # (16, N*196)

    # conv2 patches, flat channels-last rows (N*56, 144); rows padded 49 -> 56.
    y1 = jnp.transpose(y1t.reshape(16, n, h1, w1), (1, 2, 3, 0))         # (N,14,14,16)
    y1p = jnp.pad(y1, ((0, 0), (1, 1), (1, 1), (0, 0)))
    cols2 = [y1p[:, ky:ky + h1:2, kx:kx + w1:2, :]
             for ky in range(3) for kx in range(3)]            # 9 x (N,7,7,16)
    p2 = jnp.stack(cols2, axis=3)                              # (N,7,7,9,16)
    p2 = jnp.transpose(p2, (0, 1, 2, 4, 3)).reshape(n, POOL_ROWS, 16 * 9)  # cin-major
    p2 = jnp.pad(p2, ((0, 0), (0, POOL_ROWS_PAD - POOL_ROWS), (0, 0)))
    p2 = p2.reshape(n * POOL_ROWS_PAD, 16 * 9)

    return head(p2, params['w2m'], params['g2'], params['b2'],
                params['wlt'], params['bl'], n)                # (N, 10)


# ----------------------------- pure-JAX reference -----------------------------

def _bn_train(y_nchw, g, b):
    mean = jnp.mean(y_nchw, axis=(0, 2, 3), keepdims=True)
    var = jnp.mean((y_nchw - mean) ** 2, axis=(0, 2, 3), keepdims=True)
    return (y_nchw - mean) * jax.lax.rsqrt(var + EPS) \
        * g.reshape(1, -1, 1, 1) + b.reshape(1, -1, 1, 1)


def reference_forward(x_nchw, params):
    dn = ('NCHW', 'OIHW', 'NCHW')
    hp = jax.lax.Precision.HIGHEST
    y = jax.lax.conv_general_dilated(x_nchw, params['w1'], (2, 2),
                                     [(1, 1), (1, 1)], dimension_numbers=dn,
                                     precision=hp)
    y = jnp.maximum(_bn_train(y, params['g1'], params['b1']), 0.0)
    y = jax.lax.conv_general_dilated(y, params['w2'], (2, 2),
                                     [(1, 1), (1, 1)], dimension_numbers=dn,
                                     precision=hp)
    y = jnp.maximum(_bn_train(y, params['g2'], params['b2']), 0.0)
    y = jnp.max(y, axis=(2, 3))                                # MaxPool2d(7,1) -> (N,32)
    logits = jnp.dot(y, params['wl'].T, precision=hp) + params['bl']
    return jax.nn.softmax(logits, axis=1)


# ----------------------------------- main -------------------------------------

if __name__ == "__main__":
    key = jax.random.PRNGKey(0)
    kx, k1, k2, k3, k4, k5, k6, k7, k8 = jax.random.split(key, 9)

    # Deterministic synthetic parameters (shapes follow the PyTorch module).
    w1 = jax.random.normal(k1, (16, 1, 3, 3), jnp.float32) * 0.2    # Conv2d(1,16,3,2,1)
    g1 = 1.0 + 0.1 * jax.random.normal(k2, (16,), jnp.float32)      # BatchNorm2d(16)
    b1 = 0.1 * jax.random.normal(k3, (16,), jnp.float32)
    w2 = jax.random.normal(k4, (32, 16, 3, 3), jnp.float32) * 0.1   # Conv2d(16,32,3,2,1)
    g2 = 1.0 + 0.1 * jax.random.normal(k5, (32,), jnp.float32)      # BatchNorm2d(32)
    b2 = 0.1 * jax.random.normal(k6, (32,), jnp.float32)
    wl = jax.random.normal(k7, (10, 32), jnp.float32) * 0.2         # Linear(32,10)
    bl = 0.1 * jax.random.normal(k8, (10,), jnp.float32)

    params = dict(
        w1=w1, g1=g1, b1=b1, w2=w2, g2=g2, b2=b2, wl=wl, bl=bl,
        w1m=w1.reshape(16, 9),            # (16, 9)   lhs of transposed conv1
        w2m=w2.reshape(32, 16 * 9).T,     # (144, 32) cin-major, tap-minor cols
        wlt=wl.T,                         # (32, 10)
    )

    # Input implied by the module: 1 channel, 28x28 (14 -> 7 -> MaxPool(7) -> 1).
    x = jax.random.normal(kx, (2, 1, 28, 28), jnp.float32)

    fwd = jax.jit(encoder_forward)
    out = jax.block_until_ready(fwd(x, params))

    ref = jax.block_until_ready(reference_forward(x, params))
    np.testing.assert_allclose(np.asarray(out), np.asarray(ref),
                               rtol=1e-3, atol=1e-3)
    assert out.shape == (2, 10)
    print("KERNEL_OK")
</pallas_src>

<mosaic_0001>
module attributes {stable_mosaic.version = 11 : i64} {
  func.func @_conv1_bn_relu_kernel(%arg0: i32, %arg1: memref<9x392xf32, #tpu.memory_space<vmem>>, %arg2: memref<16x9xf32, #tpu.memory_space<vmem>>, %arg3: memref<16x1xf32, #tpu.memory_space<vmem>>, %arg4: memref<16x1xf32, #tpu.memory_space<vmem>>, %arg5: memref<16x392xf32, #tpu.memory_space<vmem>>) attributes {dimension_semantics = [#tpu.dimension_semantics<arbitrary>], iteration_bounds = array<i64: 1>, scalar_prefetch = 0 : i64, scratch_operands = 0 : i64, tpu.core_type = #tpu.core_type<tc>, window_params = [{pipeline_mode = #tpu.pipeline_mode<synchronous>, transform_indices = @transform_0, window_bounds = array<i64: 9, 392>}, {pipeline_mode = #tpu.pipeline_mode<synchronous>, transform_indices = @transform_1, window_bounds = array<i64: 16, 9>}, {pipeline_mode = #tpu.pipeline_mode<synchronous>, transform_indices = @transform_2, window_bounds = array<i64: 16, 1>}, {pipeline_mode = #tpu.pipeline_mode<synchronous>, transform_indices = @transform_3, window_bounds = array<i64: 16, 1>}, {pipeline_mode = #tpu.pipeline_mode<synchronous>, transform_indices = @transform_4, window_bounds = array<i64: 16, 392>}]} {
    %c0 = arith.constant 0 : index
    %c0_0 = arith.constant 0 : index
    %0 = vector.load %arg2[%c0, %c0_0] : memref<16x9xf32, #tpu.memory_space<vmem>>, vector<16x9xf32>
    %c0_1 = arith.constant 0 : index
    %c0_2 = arith.constant 0 : index
    %1 = vector.load %arg1[%c0_1, %c0_2] : memref<9x392xf32, #tpu.memory_space<vmem>>, vector<9x392xf32>
    %cst = arith.constant dense<0.000000e+00> : vector<16x392xf32>
    %2 = tpu.matmul %0, %1, %cst {dimension_numbers = #tpu.dot_dimension_numbers<[1], [0], [0], [1], [0, 0, 1, 1], [], []>, precision = #tpu.contract_precision<fp32>} : vector<16x9xf32>, vector<9x392xf32>, vector<16x392xf32> -> vector<16x392xf32>
    %cst_3 = arith.constant dense<0.000000e+00> : vector<16xf32>
    %3 = vector.multi_reduction <add>, %2, %cst_3 [1] : vector<16x392xf32> to vector<16xf32>
    %4 = vector.shape_cast %3 : vector<16xf32> to vector<16x1xf32>
    %cst_4 = arith.constant 3.920000e+02 : f32
    %5 = vector.broadcast %cst_4 : f32 to vector<16x1xf32>
    %6 = arith.divf %4, %5 : vector<16x1xf32>
    %7 = vector.broadcast %6 : vector<16x1xf32> to vector<16x392xf32>
    %8 = arith.subf %2, %7 : vector<16x392xf32>
    %9 = arith.mulf %8, %8 : vector<16x392xf32>
    %cst_5 = arith.constant dense<0.000000e+00> : vector<16xf32>
    %10 = vector.multi_reduction <add>, %9, %cst_5 [1] : vector<16x392xf32> to vector<16xf32>
    %11 = vector.shape_cast %10 : vector<16xf32> to vector<16x1xf32>
    %cst_6 = arith.constant 3.920000e+02 : f32
    %12 = vector.broadcast %cst_6 : f32 to vector<16x1xf32>
    %13 = arith.divf %11, %12 : vector<16x1xf32>
    %14 = vector.broadcast %6 : vector<16x1xf32> to vector<16x392xf32>
    %15 = arith.subf %2, %14 : vector<16x392xf32>
    %cst_7 = arith.constant 9.99999974E-6 : f32
    %16 = vector.broadcast %cst_7 : f32 to vector<16x1xf32>
    %17 = arith.addf %13, %16 : vector<16x1xf32>
    %18 = math.rsqrt %17 : vector<16x1xf32>
    %19 = vector.broadcast %18 : vector<16x1xf32> to vector<16x392xf32>
    %20 = arith.mulf %15, %19 : vector<16x392xf32>
    %c0_8 = arith.constant 0 : index
    %c0_9 = arith.constant 0 : index
    %21 = vector.load %arg3[%c0_8, %c0_9] : memref<16x1xf32, #tpu.memory_space<vmem>>, vector<16x1xf32>
    %22 = vector.broadcast %21 : vector<16x1xf32> to vector<16x392xf32>
    %23 = arith.mulf %20, %22 : vector<16x392xf32>
    %c0_10 = arith.constant 0 : index
    %c0_11 = arith.constant 0 : index
    %24 = vector.load %arg4[%c0_10, %c0_11] : memref<16x1xf32, #tpu.memory_space<vmem>>, vector<16x1xf32>
    %25 = vector.broadcast %24 : vector<16x1xf32> to vector<16x392xf32>
    %26 = arith.addf %23, %25 : vector<16x392xf32>
    %cst_12 = arith.constant 0.000000e+00 : f32
    %27 = vector.broadcast %cst_12 : f32 to vector<16x392xf32>
    %28 = arith.maximumf %26, %27 : vector<16x392xf32>
    %c0_13 = arith.constant 0 : index
    %c0_14 = arith.constant 0 : index
    %29 = vector.load %arg5[%c0_13, %c0_14] : memref<16x392xf32, #tpu.memory_space<vmem>>, vector<16x392xf32>
    tpu.vector_store %arg5[%c0_13, %c0_14], %28 {strides = array<i32>} : memref<16x392xf32, #tpu.memory_space<vmem>>, vector<16x392xf32>,
    return
  }
  func.func @transform_0(%arg0: i32) -> (i32, i32) {
    %c0_i32 = arith.constant 0 : i32
    %c0_i32_0 = arith.constant 0 : i32
    %c0_i32_1 = arith.constant 0 : i32
    return %c0_i32, %c0_i32_0 : i32, i32
  }
  func.func @transform_1(%arg0: i32) -> (i32, i32) {
    %c0_i32 = arith.constant 0 : i32
    %c0_i32_0 = arith.constant 0 : i32
    %c0_i32_1 = arith.constant 0 : i32
    return %c0_i32, %c0_i32_0 : i32, i32
  }
  func.func @transform_2(%arg0: i32) -> (i32, i32) {
    %c0_i32 = arith.constant 0 : i32
    %c0_i32_0 = arith.constant 0 : i32
    %c0_i32_1 = arith.constant 0 : i32
    return %c0_i32, %c0_i32_0 : i32, i32
  }
  func.func @transform_3(%arg0: i32) -> (i32, i32) {
    %c0_i32 = arith.constant 0 : i32
    %c0_i32_0 = arith.constant 0 : i32
    %c0_i32_1 = arith.constant 0 : i32
    return %c0_i32, %c0_i32_0 : i32, i32
  }
  func.func @transform_4(%arg0: i32) -> (i32, i32) {
    %c0_i32 = arith.constant 0 : i32
    %c0_i32_0 = arith.constant 0 : i32
    %c0_i32_1 = arith.constant 0 : i32
    return %c0_i32, %c0_i32_0 : i32, i32
  }
}

module attributes {stable_mosaic.version = 11 : i64} {
  func.func @_head_kernel(%arg0: i32, %arg1: memref<112x144xf32, #tpu.memory_space<vmem>>, %arg2: memref<144x32xf32, #tpu.memory_space<vmem>>, %arg3: memref<1x32xf32, #tpu.memory_space<vmem>>, %arg4: memref<1x32xf32, #tpu.memory_space<vmem>>, %arg5: memref<32x10xf32, #tpu.memory_space<vmem>>, %arg6: memref<1x10xf32, #tpu.memory_space<vmem>>, %arg7: memref<2x10xf32, #tpu.memory_space<vmem>>) attributes {dimension_semantics = [#tpu.dimension_semantics<arbitrary>], iteration_bounds = array<i64: 1>, scalar_prefetch = 0 : i64, scratch_operands = 0 : i64, tpu.core_type = #tpu.core_type<tc>, window_params = [{pipeline_mode = #tpu.pipeline_mode<synchronous>, transform_indices = @transform_0, window_bounds = array<i64: 112, 144>}, {pipeline_mode = #tpu.pipeline_mode<synchronous>, transform_indices = @transform_1, window_bounds = array<i64: 144, 32>}, {pipeline_mode = #tpu.pipeline_mode<synchronous>, transform_indices = @transform_2, window_bounds = array<i64: 1, 32>}, {pipeline_mode = #tpu.pipeline_mode<synchronous>, transform_indices = @transform_3, window_bounds = array<i64: 1, 32>}, {pipeline_mode = #tpu.pipeline_mode<synchronous>, transform_indices = @transform_4, window_bounds = array<i64: 32, 10>}, {pipeline_mode = #tpu.pipeline_mode<synchronous>, transform_indices = @transform_5, window_bounds = array<i64: 1, 10>}, {pipeline_mode = #tpu.pipeline_mode<synchronous>, transform_indices = @transform_6, window_bounds = array<i64: 2, 10>}]} {
    %c0 = arith.constant 0 : index
    %c0_0 = arith.constant 0 : index
    %0 = vector.load %arg1[%c0, %c0_0] : memref<112x144xf32, #tpu.memory_space<vmem>>, vector<112x144xf32>
    %c0_1 = arith.constant 0 : index
    %c0_2 = arith.constant 0 : index
    %1 = vector.load %arg2[%c0_1, %c0_2] : memref<144x32xf32, #tpu.memory_space<vmem>>, vector<144x32xf32>
    %cst = arith.constant dense<0.000000e+00> : vector<112x32xf32>
    %2 = tpu.matmul %0, %1, %cst {dimension_numbers = #tpu.dot_dimension_numbers<[1], [0], [0], [1], [0, 0, 1, 1], [], []>, precision = #tpu.contract_precision<fp32>} : vector<112x144xf32>, vector<144x32xf32>, vector<112x32xf32> -> vector<112x32xf32>
    %cst_3 = arith.constant dense<0.000000e+00> : vector<32xf32>
    %3 = vector.multi_reduction <add>, %2, %cst_3 [0] : vector<112x32xf32> to vector<32xf32>
    %4 = vector.shape_cast %3 : vector<32xf32> to vector<1x32xf32>
    %cst_4 = arith.constant 9.800000e+01 : f32
    %5 = vector.broadcast %cst_4 : f32 to vector<1x32xf32>
    %6 = arith.divf %4, %5 : vector<1x32xf32>
    %7 = arith.mulf %2, %2 : vector<112x32xf32>
    %cst_5 = arith.constant dense<0.000000e+00> : vector<32xf32>
    %8 = vector.multi_reduction <add>, %7, %cst_5 [0] : vector<112x32xf32> to vector<32xf32>
    %9 = vector.shape_cast %8 : vector<32xf32> to vector<1x32xf32>
    %cst_6 = arith.constant 9.800000e+01 : f32
    %10 = vector.broadcast %cst_6 : f32 to vector<1x32xf32>
    %11 = arith.divf %9, %10 : vector<1x32xf32>
    %12 = arith.mulf %6, %6 : vector<1x32xf32>
    %13 = arith.subf %11, %12 : vector<1x32xf32>
    %14 = vector.broadcast %6 : vector<1x32xf32> to vector<112x32xf32>
    %15 = arith.subf %2, %14 : vector<112x32xf32>
    %cst_7 = arith.constant 9.99999974E-6 : f32
    %16 = vector.broadcast %cst_7 : f32 to vector<1x32xf32>
    %17 = arith.addf %13, %16 : vector<1x32xf32>
    %18 = math.rsqrt %17 : vector<1x32xf32>
    %19 = vector.broadcast %18 : vector<1x32xf32> to vector<112x32xf32>
    %20 = arith.mulf %15, %19 : vector<112x32xf32>
    %c0_8 = arith.constant 0 : index
    %c0_9 = arith.constant 0 : index
    %21 = vector.load %arg3[%c0_8, %c0_9] : memref<1x32xf32, #tpu.memory_space<vmem>>, vector<1x32xf32>
    %22 = vector.broadcast %21 : vector<1x32xf32> to vector<112x32xf32>
    %23 = arith.mulf %20, %22 : vector<112x32xf32>
    %c0_10 = arith.constant 0 : index
    %c0_11 = arith.constant 0 : index
    %24 = vector.load %arg4[%c0_10, %c0_11] : memref<1x32xf32, #tpu.memory_space<vmem>>, vector<1x32xf32>
    %25 = vector.broadcast %24 : vector<1x32xf32> to vector<112x32xf32>
    %26 = arith.addf %23, %25 : vector<112x32xf32>
    %cst_12 = arith.constant 0.000000e+00 : f32
    %27 = vector.broadcast %cst_12 : f32 to vector<112x32xf32>
    %28 = arith.maximumf %26, %27 : vector<112x32xf32>
    %29 = vector.shape_cast %28 : vector<112x32xf32> to vector<2x56x32xf32>
    %30 = tpu.iota {dimensions = array<i32: 1>} : vector<2x56x32xi32>
    %c49_i32 = arith.constant 49 : i32
    %31 = vector.broadcast %c49_i32 : i32 to vector<2x56x32xi32>
    %32 = arith.cmpi slt, %30, %31 : vector<2x56x32xi32>
    %cst_13 = arith.constant 0.000000e+00 : f32
    %33 = vector.broadcast %cst_13 : f32 to vector<2x56x32xf32>
    %34 = arith.select %32, %29, %33 : vector<2x56x32xi1>, vector<2x56x32xf32>
    %cst_14 = arith.constant dense<0xFF800000> : vector<2x32xf32>
    %35 = vector.multi_reduction <maximumf>, %34, %cst_14 [1] : vector<2x56x32xf32> to vector<2x32xf32>
    %c0_15 = arith.constant 0 : index
    %c0_16 = arith.constant 0 : index
    %36 = vector.load %arg5[%c0_15, %c0_16] : memref<32x10xf32, #tpu.memory_space<vmem>>, vector<32x10xf32>
    %cst_17 = arith.constant dense<0.000000e+00> : vector<2x10xf32>
    %37 = tpu.matmul %35, %36, %cst_17 {dimension_numbers = #tpu.dot_dimension_numbers<[1], [0], [0], [1], [0, 0, 1, 1], [], []>, precision = #tpu.contract_precision<fp32>} : vector<2x32xf32>, vector<32x10xf32>, vector<2x10xf32> -> vector<2x10xf32>
    %c0_18 = arith.constant 0 : index
    %c0_19 = arith.constant 0 : index
    %38 = vector.load %arg6[%c0_18, %c0_19] : memref<1x10xf32, #tpu.memory_space<vmem>>, vector<1x10xf32>
    %39 = vector.broadcast %38 : vector<1x10xf32> to vector<2x10xf32>
    %40 = arith.addf %37, %39 : vector<2x10xf32>
    %cst_20 = arith.constant dense<0xFF800000> : vector<2xf32>
    %41 = vector.multi_reduction <maximumf>, %40, %cst_20 [1] : vector<2x10xf32> to vector<2xf32>
    %42 = vector.shape_cast %41 : vector<2xf32> to vector<2x1xf32>
    %43 = vector.broadcast %42 : vector<2x1xf32> to vector<2x10xf32>
    %44 = arith.subf %40, %43 : vector<2x10xf32>
    %45 = math.exp %44 : vector<2x10xf32>
    %cst_21 = arith.constant dense<0.000000e+00> : vector<2xf32>
    %46 = vector.multi_reduction <add>, %45, %cst_21 [1] : vector<2x10xf32> to vector<2xf32>
    %47 = vector.shape_cast %46 : vector<2xf32> to vector<2x1xf32>
    %48 = tpu.reciprocal %47 {approx = true} : vector<2x1xf32> -> vector<2x1xf32>
    %49 = vector.broadcast %48 : vector<2x1xf32> to vector<2x10xf32>
    %50 = arith.mulf %45, %49 : vector<2x10xf32>
    %c0_22 = arith.constant 0 : index
    %c0_23 = arith.constant 0 : index
    %51 = vector.load %arg7[%c0_22, %c0_23] : memref<2x10xf32, #tpu.memory_space<vmem>>, vector<2x10xf32>
    tpu.vector_store %arg7[%c0_22, %c0_23], %50 {strides = array<i32>} : memref<2x10xf32, #tpu.memory_space<vmem>>, vector<2x10xf32>,
    return
  }
  func.func @transform_0(%arg0: i32) -> (i32, i32) {
    %c0_i32 = arith.constant 0 : i32
    %c0_i32_0 = arith.constant 0 : i32
    %c0_i32_1 = arith.constant 0 : i32
    return %c0_i32, %c0_i32_0 : i32, i32
  }
  func.func @transform_1(%arg0: i32) -> (i32, i32) {
    %c0_i32 = arith.constant 0 : i32
    %c0_i32_0 = arith.constant 0 : i32
    %c0_i32_1 = arith.constant 0 : i32
    return %c0_i32, %c0_i32_0 : i32, i32
  }
  func.func @transform_2(%arg0: i32) -> (i32, i32) {
    %c0_i32 = arith.constant 0 : i32
    %c0_i32_0 = arith.constant 0 : i32
    %c0_i32_1 = arith.constant 0 : i32
    return %c0_i32, %c0_i32_0 : i32, i32
  }
  func.func @transform_3(%arg0: i32) -> (i32, i32) {
    %c0_i32 = arith.constant 0 : i32
    %c0_i32_0 = arith.constant 0 : i32
    %c0_i32_1 = arith.constant 0 : i32
    return %c0_i32, %c0_i32_0 : i32, i32
  }
  func.func @transform_4(%arg0: i32) -> (i32, i32) {
    %c0_i32 = arith.constant 0 : i32
    %c0_i32_0 = arith.constant 0 : i32
    %c0_i32_1 = arith.constant 0 : i32
    return %c0_i32, %c0_i32_0 : i32, i32
  }
  func.func @transform_5(%arg0: i32) -> (i32, i32) {
    %c0_i32 = arith.constant 0 : i32
    %c0_i32_0 = arith.constant 0 : i32
    %c0_i32_1 = arith.constant 0 : i32
    return %c0_i32, %c0_i32_0 : i32, i32
  }
  func.func @transform_6(%arg0: i32) -> (i32, i32) {
    %c0_i32 = arith.constant 0 : i32
    %c0_i32_0 = arith.constant 0 : i32
    %c0_i32_1 = arith.constant 0 : i32
    return %c0_i32, %c0_i32_0 : i32, i32
  }
}

</mosaic_0001>

<bundles_post_ra>
// kernel: encoder_forward.2
= control target key start
LH: loop header
LB: loop body
LE: loop exit
PB: predicated region body
PF: predicated region fallthrough
CT: control target
= control target key end

     0   :  { %vm34_vm0 = vcmask 1040384   ;;  %vm27_vm1 = vcmask 72704   ;;  %v1253_v3 = vmov 0.0   ;;  %vm1129_vm2 = vcmask 64512   ;;  %s1530_s0 = inlined_call_operand.vmem [shape: f32[9,392], index: 0, kind: input, shape index: {}]   ;;  %s1531_s1 = inlined_call_operand.vmem [shape: f32[16,9], index: 1, kind: input, shape index: {}]   ;;  %s1532_s2 = inlined_call_operand.vmem [shape: f32[16,1], index: 2, kind: input, shape index: {}]   ;;  %s1533_s3 = inlined_call_operand.vmem [shape: f32[16,1], index: 3, kind: input, shape index: {}]   ;;  %s1534_s4 = inlined_call_operand.vmem [shape: f32[16,392], index: 4, kind: output, shape index: {}]  }
   0x1   :  { %v24_v0 = vld [vmem:[%s1530_s0 + $0x28] sm:$0x1]  ;;  %v23_v1 = vld [vmem:[%s1530_s0 + $0x20] sm:$0x1]  ;;  %115 = vmatprep.mubr.f32.mxu0 %v1253_v3  ;;  %222 = vmatprep.mubr.f32.mxu1 %v1253_v3  ;;  %v26_v23 = vld [vmem:[%s1530_s0 + $0x38] sm:$0x1] }
   0x2   :  { %v20_v2 = vld [vmem:[%s1530_s0 + $0x8] sm:$0xff]  ;;  %v39_v4 = vsel %vm34_vm0, %v24_v0, 0  ;;  %v36_v5 = vsel %vm34_vm0, %v23_v1, 0  ;;  %v19_v7 = vld [vmem:[%s1530_s0] sm:$0xff]  ;;  %v25_v28 = vld [vmem:[%s1530_s0 + $0x30] sm:$0x1] }
   0x3   :  { %v1293_v6 = vand.u32 4294901760, %v20_v2  ;;  %v17_v8 = vld [vmem:[%s1531_s1] sm:$0xff]  ;;  %v18_v9 = vld [vmem:[%s1531_s1 + $0x8] sm:$0xff]  ;;  %v1304_v10 = vand.u32 4294901760, %v39_v4  ;;  %v1306_v11 = vand.u32 4294901760, %v36_v5  ;;  %v1308_v12 = vand.u32 4294901760, %v19_v7 }
   0x4   :  { %v29_v13 = vsel %vm27_vm1, %v17_v8, 0  ;;  %v32_v16 = vsel %vm27_vm1, %v18_v9, 0  ;;  %v45_v36 = vsel %vm34_vm0, %v26_v23, 0  ;;  %v42_v37 = vsel %vm34_vm0, %v25_v28, 0  ;;  %v22_v47 = vld [vmem:[%s1530_s0 + $0x18] sm:$0xff]  ;;  %v21_v48 = vld [vmem:[%s1530_s0 + $0x10] sm:$0xff] }
   0x5   :  { %v1311_v14 = vand.u32 4294901760, %v29_v13  ;;  %v1314_v15 = vsub.f32 %v20_v2, %v1293_v6  ;;  %76 = vmatprep.subr.mxu0 %v1304_v10  ;;  %v1319_v17 = vsub.f32 %v39_v4, %v1304_v10  ;;  %v1322_v18 = vsub.f32 %v36_v5, %v1306_v11  ;;  %v1186_v5 = vld [vmem:[%s1532_s2 + $0x8] sm:$0xff] }
   0x6   :  { %v1325_v19 = vsub.f32 %v19_v7, %v1308_v12  ;;  %v1327_v20 = vand.u32 4294901760, %v32_v16  ;;  %78 = vmatpush1.msra.mxu0 %v1306_v11  ;;  %v1371_v44 = vand.u32 4294901760, %v45_v36  ;;  %v1376_v46 = vand.u32 4294901760, %v42_v37 }
   0x7   :  { %v1331_v21 = vsub.f32 %v29_v13, %v1311_v14  ;;  %v180_v22 = vand.u32 4294901760, %v1314_v15  ;;  %80 = vmatprep.subr.mxu0 %v1293_v6  ;;  %v168_v24 = vand.u32 4294901760, %v1319_v17  ;;  %v174_v25 = vand.u32 4294901760, %v1322_v18 }
   0x8   :  { %v186_v26 = vand.u32 4294901760, %v1325_v19  ;;  %v1342_v27 = vsub.f32 %v32_v16, %v1327_v20  ;;  %82 = vmatpush1.msra.mxu0 %v1308_v12  ;;  %v1389_v49 = vsub.f32 %v45_v36, %v1371_v44  ;;  %v1391_v50 = vand.u32 4294901760, %v22_v47 }
   0x9   :  { %v1349_v29 = vand.u32 4294901760, %v1331_v21  ;;  %v181_v30 = vsub.f32 %v1314_v15, %v180_v22  ;;  %v169_v31 = vsub.f32 %v1319_v17, %v168_v24  ;;  %v175_v32 = vsub.f32 %v1322_v18, %v174_v25  ;;  %267 = vmatprep.subr.mxu0 %v1319_v17 }
   0xa   :  { %v187_v33 = vsub.f32 %v1325_v19, %v186_v26  ;;  %v1361_v34 = vand.u32 4294901760, %v1342_v27  ;;  %v1396_v51 = vsub.f32 %v42_v37, %v1376_v46  ;;  %v1398_v52 = vand.u32 4294901760, %v21_v48 }
   0xb   :  { %v119_v35 = vsub.f32 %v1331_v21, %v1349_v29  ;;  %v170_v38 = vand.u32 4294901760, %v169_v31  ;;  %v176_v39 = vand.u32 4294901760, %v175_v32  ;;  %v182_v40 = vand.u32 4294901760, %v181_v30 }
   0xc   :  { %v130_v41 = vsub.f32 %v1342_v27, %v1361_v34  ;;  %v188_v43 = vand.u32 4294901760, %v187_v33  ;;  %v708_v53 = vand.u32 4294901760, %v1389_v49  ;;  %v1408_v54 = vsub.f32 %v22_v47, %v1391_v50 }
   0xd   :  { %v1369_v42 = vand.u32 4294901760, %v119_v35  ;;  %171 = vmatprep.subr.mxu1 %v170_v38  ;;  %v714_v55 = vand.u32 4294901760, %v1396_v51  ;;  %v1414_v56 = vsub.f32 %v21_v48, %v1398_v52  ;;  %v1254_v4 = vmov 0  }
   0xe   :  { %177 = vmatpush1.msra.mxu1 %v176_v39  ;;  %v1374_v45 = vand.u32 4294901760, %v130_v41  ;;  %v709_v57 = vsub.f32 %v1389_v49, %v708_v53  ;;  %v720_v58 = vand.u32 4294901760, %v1408_v54  ;;  %1248 = vset.pattern.permute.xlu1 %v1254_v4 }
   0xf   :  { %121 = vmatmul.mubr.f32.vlgmr.msra.gmra.mxu0 %v1369_v42  ;;  %183 = vmatprep.subr.mxu1 %v182_v40  ;;  %v715_v59 = vsub.f32 %v1396_v51, %v714_v55  ;;  %v726_v60 = vand.u32 4294901760, %v1414_v56 }
  0x10   :  { %126 = vmatprep.mubr.f32.mxu0 %v1253_v3  ;;  %189 = vmatpush1.msra.mxu1 %v188_v43  ;;  %v710_v61 = vand.u32 4294901760, %v709_v57  ;;  %v721_v62 = vsub.f32 %v1408_v54, %v720_v58 }
  0x11   :  { %270 = vmatpush1.msra.mxu0 %v1322_v18  ;;  %224 = vmatmul.mubr.f32.vlgmr.msra.gmra.mxu1 %v1311_v14  ;;  %v716_v63 = vand.u32 4294901760, %v715_v59  ;;  %v727_v0 = vsub.f32 %v1414_v56, %v726_v60 }
  0x12   :  { %355 = vmatprep.subr.mxu1 %v1304_v10  ;;  %273 = vmatprep.subr.mxu0 %v1314_v15  ;;  %v722_v1 = vand.u32 4294901760, %v721_v62 }
  0x13   :  { %132 = vmatmul.mubr.f32.gmra.mxu0 %v1374_v45  ;;  %357 = vmatpush1.msra.mxu1 %v1306_v11  ;;  %v728_v2 = vand.u32 4294901760, %v727_v0 }
  0x14   :  { %229 = vmatprep.mubr.f32.mxu1 %v1253_v3  ;;  %276 = vmatpush1.msra.mxu0 %v1325_v19 }
  0x15   :  { %309 = vmatprep.mubr.f32.mxu0 %v1253_v3  ;;  %231 = vmatmul.mubr.f32.gmra.mxu1 %v1327_v20 }
  0x16   :  { %359 = vmatprep.subr.mxu1 %v1293_v6  ;;  %444 = vmatprep.subr.mxu0 %v168_v24 }
  0x17   :  { %312 = vmatmul.mubr.f32.vlgmr.msra.gmra.mxu0 %v1331_v21  ;;  %361 = vmatpush1.msra.mxu1 %v1308_v12 }
  0x18   :  { %317 = vmatprep.mubr.f32.mxu0 %v1253_v3  ;;  %394 = vmatprep.mubr.f32.mxu1 %v1253_v3 }
  0x19   :  { %448 = vmatpush1.msra.mxu0 %v174_v25  ;;  %398 = vmatmul.mubr.f32.vlgmr.msra.gmra.mxu1 %v1349_v29 }
  0x1a   :  { %533 = vmatprep.subr.mxu1 %v1304_v10  ;;  %452 = vmatprep.subr.mxu0 %v180_v22 }
  0x1b   :  { %320 = vmatmul.mubr.f32.gmra.mxu0 %v1342_v27  ;;  %535 = vmatpush1.msra.mxu1 %v1306_v11 }
  0x1c   :  { %403 = vmatprep.mubr.f32.mxu1 %v1253_v3  ;;  %456 = vmatpush1.msra.mxu0 %v186_v26 }
  0x1d   :  { %489 = vmatprep.mubr.f32.mxu0 %v1253_v3  ;;  %407 = vmatmul.mubr.f32.gmra.mxu1 %v1361_v34 }
  0x1e   :  { %537 = vmatprep.subr.mxu1 %v1293_v6  ;;  %616 = vmatprep.subr.mxu0 %v1371_v44  ;;  %v1205_v6 = vld [vmem:[%s1533_s3] sm:$0xff] }
  0x1f   :  { %491 = vmatmul.mubr.f32.vlgmr.msra.gmra.mxu0 %v1311_v14  ;;  %539 = vmatpush1.msra.mxu1 %v1308_v12 }
  0x20   :  { %496 = vmatprep.mubr.f32.mxu0 %v1253_v3  ;;  %572 = vmatprep.mubr.f32.mxu1 %v1253_v3 }
  0x21   :  { %618 = vmatpush1.msra.mxu0 %v1376_v46  ;;  %574 = vmatmul.mubr.f32.vlgmr.msra.gmra.mxu1 %v1311_v14 }
  0x22   :  { %711 = vmatprep.subr.mxu1 %v710_v61  ;;  %620 = vmatprep.subr.mxu0 %v1391_v50 }
  0x23   :  { %498 = vmatmul.mubr.f32.gmra.mxu0 %v1327_v20  ;;  %717 = vmatpush1.msra.mxu1 %v716_v63 }
  0x24   :  { %579 = vmatprep.mubr.f32.mxu1 %v1253_v3  ;;  %622 = vmatpush1.msra.mxu0 %v1398_v52 }
  0x25   :  { %655 = vmatprep.mubr.f32.mxu0 %v1253_v3  ;;  %581 = vmatmul.mubr.f32.gmra.mxu1 %v1327_v20 }
  0x26   :  { %723 = vmatprep.subr.mxu1 %v722_v1  ;;  %807 = vmatprep.subr.mxu0 %v1389_v49 }
  0x27   :  { %661 = vmatmul.mubr.f32.vlgmr.msra.gmra.mxu0 %v1369_v42  ;;  %729 = vmatpush1.msra.mxu1 %v728_v2 }
  0x28   :  { %666 = vmatprep.mubr.f32.mxu0 %v1253_v3  ;;  %762 = vmatprep.mubr.f32.mxu1 %v1253_v3 }
  0x29   :  { %810 = vmatpush1.msra.mxu0 %v1396_v51  ;;  %764 = vmatmul.mubr.f32.vlgmr.msra.gmra.mxu1 %v1311_v14 }
  0x2a   :  { %895 = vmatprep.subr.mxu1 %v1371_v44  ;;  %813 = vmatprep.subr.mxu0 %v1408_v54 }
  0x2b   :  { %672 = vmatmul.mubr.f32.gmra.mxu0 %v1374_v45  ;;  %897 = vmatpush1.msra.mxu1 %v1376_v46 }
  0x2c   :  { %769 = vmatprep.mubr.f32.mxu1 %v1253_v3  ;;  %816 = vmatpush1.msra.mxu0 %v1414_v56 }
  0x2d   :  { %849 = vmatprep.mubr.f32.mxu0 %v1253_v3  ;;  %771 = vmatmul.mubr.f32.gmra.mxu1 %v1327_v20 }
  0x2e   :  { %899 = vmatprep.subr.mxu1 %v1391_v50  ;;  %984 = vmatprep.subr.mxu0 %v708_v53 }
  0x2f   :  { %852 = vmatmul.mubr.f32.vlgmr.msra.gmra.mxu0 %v1331_v21  ;;  %901 = vmatpush1.msra.mxu1 %v1398_v52 }
  0x30   :  { %857 = vmatprep.mubr.f32.mxu0 %v1253_v3  ;;  %934 = vmatprep.mubr.f32.mxu1 %v1253_v3 }
  0x31   :  { %988 = vmatpush1.msra.mxu0 %v714_v55  ;;  %938 = vmatmul.mubr.f32.vlgmr.msra.gmra.mxu1 %v1349_v29 }
  0x32   :  { %1073 = vmatprep.subr.mxu1 %v1371_v44  ;;  %992 = vmatprep.subr.mxu0 %v720_v58 }
  0x33   :  { %860 = vmatmul.mubr.f32.gmra.mxu0 %v1342_v27  ;;  %1075 = vmatpush1.msra.mxu1 %v1376_v46 }
  0x34   :  { %943 = vmatprep.mubr.f32.mxu1 %v1253_v3  ;;  %996 = vmatpush1.msra.mxu0 %v726_v60 }
  0x35   :  { %1029 = vmatprep.mubr.f32.mxu0 %v1253_v3  ;;  %947 = vmatmul.mubr.f32.gmra.mxu1 %v1361_v34 }
  0x36   :  { %1077 = vmatprep.subr.mxu1 %v1391_v50  ;;  %1112 = vmatprep.mubr.f32.mxu1 %v1253_v3 }
  0x37   :  { %1031 = vmatmul.mubr.f32.vlgmr.msra.gmra.mxu0 %v1311_v14  ;;  %1079 = vmatpush1.msra.mxu1 %v1398_v52 }
  0x38   :  { %1036 = vmatprep.mubr.f32.mxu0 %v1253_v3  ;;  %1247 = vset.pattern.permute.xlu0 %v1254_v4 }
  0x39   :  { %1114 = vmatmul.mubr.f32.vlgmr.msra.gmra.mxu1 %v1311_v14  ;;  %1194 = vperm.xlu1 %1248, %v1186_v5  }
  0x3a   :  { %1119 = vmatprep.mubr.f32.mxu1 %v1253_v3 }
  0x3b   :  { %1038 = vmatmul.mubr.f32.gmra.mxu0 %v1327_v20 }
  0x3d   :  { %1121 = vmatmul.mubr.f32.gmra.mxu1 %v1327_v20  ;;  %1209 = vperm.xlu1 %1248, %v1205_v6  }
  0xcf   :  { %v122_v7 = vpop.f32.mrf.mxu0 }
  0xd1   :  { %v124_v8 = vpop.f32.mrf.mxu0  ;;  %v225_v9 = vpop.f32.mrf.mxu1 }
  0xd2   :  { %v226_v39 = vadd.f32 %v225_v9, %v122_v7 }
  0xd3   :  { %v133_v10 = vpop.f32.mrf.mxu0  ;;  %v227_v3 = vpop.f32.mrf.mxu1 }
  0xd4   :  { %v228_v36 = vadd.f32 %v227_v3, %v124_v8 }
  0xd5   :  { %v135_v11 = vpop.f32.mrf.mxu0  ;;  %v232_v12 = vpop.f32.mrf.mxu1 }
  0xd6   :  { %v233_v49 = vadd.f32 %v232_v12, %v133_v10 }
  0xd7   :  { %v313_v13 = vpop.f32.mrf.mxu0  ;;  %v234_v14 = vpop.f32.mrf.mxu1 }
  0xd8   :  { %v314_v43 = vadd.f32 %v313_v13, %v226_v39  ;;  %v235_v44 = vadd.f32 %v234_v14, %v135_v11 }
  0xd9   :  { %v315_v15 = vpop.f32.mrf.mxu0  ;;  %v399_v16 = vpop.f32.mrf.mxu1 }
  0xda   :  { %v316_v40 = vadd.f32 %v315_v15, %v228_v36  ;;  %v400_v50 = vadd.f32 %v399_v16, %v314_v43 }
  0xdb   :  { %v321_v17 = vpop.f32.mrf.mxu0  ;;  %v401_v18 = vpop.f32.mrf.mxu1 }
  0xdc   :  { %v402_v45 = vadd.f32 %v401_v18, %v316_v40  ;;  %v322_v57 = vadd.f32 %v321_v17, %v233_v49 }
  0xdd   :  { %v323_v19 = vpop.f32.mrf.mxu0  ;;  %v408_v20 = vpop.f32.mrf.mxu1 }
  0xde   :  { %v324_v51 = vadd.f32 %v323_v19, %v235_v44  ;;  %v409_v2 = vadd.f32 %v408_v20, %v322_v57 }
  0xdf   :  { %v492_v21 = vpop.f32.mrf.mxu0  ;;  %v410_v22 = vpop.f32.mrf.mxu1 }
  0xe0   :  { %v493_v58 = vadd.f32 %v492_v21, %v400_v50  ;;  %v411_v59 = vadd.f32 %v410_v22, %v324_v51 }
  0xe1   :  { %v494_v23 = vpop.f32.mrf.mxu0  ;;  %v575_v24 = vpop.f32.mrf.mxu1 }
  0xe2   :  { %v495_v52 = vadd.f32 %v494_v23, %v402_v45  ;;  %v576_v4 = vadd.f32 %v575_v24, %v493_v58 }
  0xe3   :  { %v499_v25 = vpop.f32.mrf.mxu0  ;;  %v577_v26 = vpop.f32.mrf.mxu1 }
  0xe4   :  { %v578_v60 = vadd.f32 %v577_v26, %v495_v52  ;;  %v500_v11 = vadd.f32 %v499_v25, %v409_v2 }
  0xe5   :  { %v501_v27 = vpop.f32.mrf.mxu0  ;;  %v582_v28 = vpop.f32.mrf.mxu1 }
  0xe6   :  { %v502_v5 = vadd.f32 %v501_v27, %v411_v59  ;;  %v1127_v12 = vadd.f32 %v578_v60, %v576_v4  ;;  %v583_v21 = vadd.f32 %v582_v28, %v500_v11 }
  0xe7   :  { %v662_v29 = vpop.f32.mrf.mxu0  ;;  %v584_v30 = vpop.f32.mrf.mxu1 }
  0xe8   :  { %v585_v13 = vadd.f32 %v584_v30, %v502_v5  ;;  %v1195_v5 = vpop.permute.xlu1 %1194 }
  0xe9   :  { %v664_v31 = vpop.f32.mrf.mxu0  ;;  %v765_v32 = vpop.f32.mrf.mxu1 }
  0xea   :  { %v766_v47 = vadd.f32 %v765_v32, %v662_v29 }
  0xeb   :  { %v673_v33 = vpop.f32.mrf.mxu0  ;;  %v767_v34 = vpop.f32.mrf.mxu1 }
  0xec   :  { %v768_v54 = vadd.f32 %v767_v34, %v664_v31  ;;  %v1134_v31 = vadd.f32 %v585_v13, %v583_v21 }
  0xed   :  { %v675_v35 = vpop.f32.mrf.mxu0  ;;  %v772_v37 = vpop.f32.mrf.mxu1 }
  0xee   :  { %v773_v62 = vadd.f32 %v772_v37, %v673_v33 }
  0xef   :  { %v853_v38 = vpop.f32.mrf.mxu0  ;;  %v774_v41 = vpop.f32.mrf.mxu1 }
  0xf0   :  { %v854_v55 = vadd.f32 %v853_v38, %v766_v47  ;;  %v775_v7 = vadd.f32 %v774_v41, %v675_v35  ;;  %v1185_v38 = vld [vmem:[%s1532_s2] sm:$0xff] }
  0xf1   :  { %v855_v42 = vpop.f32.mrf.mxu0  ;;  %v939_v46 = vpop.f32.mrf.mxu1 }
  0xf2   :  { %v856_v63 = vadd.f32 %v855_v42, %v768_v54  ;;  %v940_v0 = vadd.f32 %v939_v46, %v854_v55 }
  0xf3   :  { %v861_v48 = vpop.f32.mrf.mxu0  ;;  %v941_v53 = vpop.f32.mrf.mxu1 }
  0xf4   :  { %v862_v8 = vadd.f32 %v861_v48, %v773_v62  ;;  %v942_v9 = vadd.f32 %v941_v53, %v856_v63 }
  0xf5   :  { %v863_v56 = vpop.f32.mrf.mxu0  ;;  %v948_v61 = vpop.f32.mrf.mxu1 }
  0xf6   :  { %v864_v15 = vadd.f32 %v863_v56, %v775_v7  ;;  %v949_v16 = vadd.f32 %v948_v61, %v862_v8 }
  0xf7   :  { %v1032_v1 = vpop.f32.mrf.mxu0  ;;  %v950_v6 = vpop.f32.mrf.mxu1 }
  0xf8   :  { %v1033_v10 = vadd.f32 %v1032_v1, %v940_v0  ;;  %v951_v20 = vadd.f32 %v950_v6, %v864_v15  ;;  %v1210_v6 = vpop.permute.xlu1 %1209 }
  0xf9   :  { %v1034_v3 = vpop.f32.mrf.mxu0  ;;  %v1115_v14 = vpop.f32.mrf.mxu1 }
  0xfa   :  { %v1035_v17 = vadd.f32 %v1034_v3, %v942_v9  ;;  %v1116_v19 = vadd.f32 %v1115_v14, %v1033_v10 }
  0xfb   :  { %v1039_v18 = vpop.f32.mrf.mxu0  ;;  %v1117_v22 = vpop.f32.mrf.mxu1 }
  0xfc   :  { %v1040_v23 = vadd.f32 %v1039_v18, %v949_v16  ;;  %v1118_v26 = vadd.f32 %v1117_v22, %v1035_v17  ;;  %v1128_v27 = vadd.f32 %v1127_v12, %v1116_v19 }
  0xfd   :  { %v1041_v24 = vpop.f32.mrf.mxu0  ;;  %v1122_v29 = vpop.f32.mrf.mxu1 }
  0xfe   :  { %v1042_v32 = vadd.f32 %v1041_v24, %v951_v20  ;;  %v1123_v25 = vadd.f32 %v1122_v29, %v1040_v23  ;;  %v1130_v30 = vsel %vm1129_vm2, %v1118_v26, 0.0 }
  0xff   :  { %v1124_v33 = vpop.f32.mrf.mxu1  ;;  %v1131_v34 = vadd.f32 %v1130_v30, %v1128_v27 }
 0x100   :  { %v1135_v35 = vadd.f32 %v1134_v31, %v1123_v25  ;;  %v1125_v36 = vadd.f32 %v1124_v33, %v1042_v32 }
 0x101   :  { %1132 = vadd.xlane.f32.xlu0 %v1131_v34 }
 0x102   :  { %v1136_v28 = vsel %vm1129_vm2, %v1125_v36, 0.0 }
 0x103   :  { %v1137_v37 = vadd.f32 %v1136_v28, %v1135_v35 }
 0x105   :  { %1138 = vadd.xlane.f32.xlu0 %v1137_v37 }
 0x11b   :  { %1189 = vperm.xlu0 %1247, %v1185_v38  }
 0x18a   :  { %v1133_v39 = vpop.xlane.xlu0 %1132 }
 0x18b   :  { %v1141_v40 = vmul.f32 0.0025510204, %v1133_v39 }
 0x18d   :  { %v1143_v41 = vsub.f32 %v576_v4, %v1141_v40  ;;  %v1144_v42 = vsub.f32 %v578_v60, %v1141_v40  ;;  %v1145_v43 = vsub.f32 %v1116_v19, %v1141_v40  ;;  %v1146_v44 = vsub.f32 %v1118_v26, %v1141_v40  ;;  %v1206_v4 = vld [vmem:[%s1533_s3 + $0x8] sm:$0xff] }
 0x18e   :  { %v1139_v45 = vpop.xlane.xlu0 %1138 }
 0x18f   :  { %v1142_v46 = vmul.f32 0.0025510204, %v1139_v45  ;;  %v1151_v47 = vmul.f32 %v1143_v41, %v1143_v41  ;;  %v1152_v48 = vmul.f32 %v1144_v42, %v1144_v42  ;;  %v1153_v49 = vmul.f32 %v1145_v43, %v1145_v43 }
 0x190   :  { %v1154_v50 = vmul.f32 %v1146_v44, %v1146_v44 }
 0x191   :  { %v1147_v51 = vsub.f32 %v583_v21, %v1142_v46  ;;  %v1148_v52 = vsub.f32 %v585_v13, %v1142_v46  ;;  %v1159_v53 = vadd.f32 %v1152_v48, %v1151_v47  ;;  %v1149_v54 = vsub.f32 %v1123_v25, %v1142_v46 }
 0x192   :  { %v1150_v55 = vsub.f32 %v1125_v36, %v1142_v46  ;;  %v1161_v59 = vsel %vm1129_vm2, %v1154_v50, 0.0 }
 0x193   :  { %v1160_v56 = vadd.f32 %v1159_v53, %v1153_v49  ;;  %v1155_v57 = vmul.f32 %v1147_v51, %v1147_v51  ;;  %v1156_v58 = vmul.f32 %v1148_v52, %v1148_v52  ;;  %v1157_v62 = vmul.f32 %v1149_v54, %v1149_v54 }
 0x194   :  { %v1158_v61 = vmul.f32 %v1150_v55, %v1150_v55 }
 0x195   :  { %v1162_v60 = vadd.f32 %v1161_v59, %v1160_v56  ;;  %v1165_v63 = vadd.f32 %v1156_v58, %v1155_v57 }
 0x196   :  { %v1167_v1 = vsel %vm1129_vm2, %v1158_v61, 0.0  ;;  %v1190_v13 = vpop.permute.xlu0 %1189 }
 0x197   :  { %1163 = vadd.xlane.f32.xlu1 %v1162_v60  ;;  %v1166_v0 = vadd.f32 %v1165_v63, %v1157_v62 }
 0x199   :  { %v1168_v2 = vadd.f32 %v1167_v1, %v1166_v0 }
 0x19b   :  { %1169 = vadd.xlane.f32.xlu1 %v1168_v2 }
 0x1ac   :  { %1214 = vperm.xlu1 %1248, %v1206_v4  }
 0x220   :  { %v1164_v7 = vpop.xlane.xlu1 %1163 }
 0x221   :  { %v1171_v8 = vmul.f32 0.0025510204, %v1164_v7 }
 0x223   :  { %v1173_v9 = vadd.f32 1e-05, %v1171_v8 }
 0x224   :  { %v1170_v10 = vpop.xlane.xlu1 %1169 }
 0x225   :  { %1249 = vrsqrt.f32 %v1173_v9  ;;  %v1172_v3 = vmul.f32 0.0025510204, %v1170_v10 }
 0x227   :  { %v1174_v11 = vadd.f32 1e-05, %v1172_v3 }
 0x228   :  { %v1215_v36 = vpop.permute.xlu1 %1214 }
 0x229   :  { %1251 = vrsqrt.f32 %v1174_v11 }
 0x232   :  { %v1250_v12 = vpop.eup %1249 }
 0x233   :  { %v1177_v14 = vmul.f32 %v1250_v12, %v1143_v41  ;;  %v1178_v15 = vmul.f32 %v1250_v12, %v1144_v42  ;;  %v1179_v16 = vmul.f32 %v1250_v12, %v1145_v43  ;;  %v1180_v17 = vmul.f32 %v1250_v12, %v1146_v44 }
 0x235   :  { %v1197_v18 = vmul.f32 %v1190_v13, %v1177_v14  ;;  %v1198_v19 = vmul.f32 %v1190_v13, %v1178_v15  ;;  %v1199_v21 = vmul.f32 %v1190_v13, %v1179_v16  ;;  %v1200_v22 = vmul.f32 %v1190_v13, %v1180_v17 }
 0x236   :  { %v1252_v20 = vpop.eup %1251 }
 0x237   :  { %v1181_v23 = vmul.f32 %v1252_v20, %v1147_v51  ;;  %v1182_v24 = vmul.f32 %v1252_v20, %v1148_v52  ;;  %v1183_v26 = vmul.f32 %v1252_v20, %v1149_v54  ;;  %v1184_v27 = vmul.f32 %v1252_v20, %v1150_v55 }
 0x238   :  { %v1217_v29 = vadd.f32 %v1210_v6, %v1197_v18  ;;  %v1218_v31 = vadd.f32 %v1210_v6, %v1198_v19  ;;  %v1219_v32 = vadd.f32 %v1210_v6, %v1199_v21  ;;  %v1220_v25 = vadd.f32 %v1210_v6, %v1200_v22 }
 0x239   :  { %v1201_v30 = vmul.f32 %v1195_v5, %v1181_v23  ;;  %v1202_v33 = vmul.f32 %v1195_v5, %v1182_v24  ;;  %v1203_v34 = vmul.f32 %v1195_v5, %v1183_v26  ;;  %v1204_v35 = vmul.f32 %v1195_v5, %v1184_v27 }
 0x23a   :  { %v1225_v28 = vmax.f32 %v1217_v29, 0.0  ;;  %v1226_v37 = vmax.f32 %v1218_v31, 0.0  ;;  %v1227_v38 = vmax.f32 %v1219_v32, 0.0  ;;  %v1228_v39 = vmax.f32 %v1220_v25, 0.0 }
 0x23b   :  { %v1221_v40 = vadd.f32 %v1215_v36, %v1201_v30  ;;  %v1222_v41 = vadd.f32 %v1215_v36, %v1202_v33  ;;  %v1223_v42 = vadd.f32 %v1215_v36, %v1203_v34  ;;  %v1224_v43 = vadd.f32 %v1215_v36, %v1204_v35 }
 0x23c   :  { %1233 = vst [vmem:[%s1534_s4] sm:$0xff] %v1225_v28  ;;  %1234 = vst [vmem:[%s1534_s4 + $0x8] sm:$0xff] %v1226_v37 }
 0x23d   :  { %1235 = vst [vmem:[%s1534_s4 + $0x10] sm:$0xff] %v1227_v38  ;;  %1236 = vst.msk [vmem:[%s1534_s4 + $0x18] sm:$0xff] %vm1129_vm2, %v1228_v39  ;;  %v1229_v44 = vmax.f32 %v1221_v40, 0.0  ;;  %v1230_v45 = vmax.f32 %v1222_v41, 0.0  ;;  %v1231_v46 = vmax.f32 %v1223_v42, 0.0  ;;  %v1232_v47 = vmax.f32 %v1224_v43, 0.0 }
 0x23f   :  { %1237 = vst [vmem:[%s1534_s4 + $0x20] sm:$0xff] %v1229_v44  ;;  %1238 = vst [vmem:[%s1534_s4 + $0x28] sm:$0xff] %v1230_v45 }
 0x240   :  { %1239 = vst [vmem:[%s1534_s4 + $0x30] sm:$0xff] %v1231_v46  ;;  %1240 = vst.msk [vmem:[%s1534_s4 + $0x38] sm:$0xff] %vm1129_vm2, %v1232_v47 }

// kernel: encoder_forward.3
= control target key start
LH: loop header
LB: loop body
LE: loop exit
PB: predicated region body
PF: predicated region fallthrough
CT: control target
= control target key end

     0   :  { %v3772_v3 = vmov 0.0   ;;  %vm70_vm0 = vcmask 130048   ;;  %s3750_s0 = inlined_call_operand.vmem [shape: f32[112,144], index: 0, kind: input, shape index: {}]   ;;  %s3751_s1 = inlined_call_operand.vmem [shape: f32[144,32], index: 1, kind: input, shape index: {}]   ;;  %s3752_s2 = inlined_call_operand.vmem [shape: f32[1,32], index: 2, kind: input, shape index: {}]   ;;  %s3753_s3 = inlined_call_operand.vmem [shape: f32[1,32], index: 3, kind: input, shape index: {}]   ;;  %s3754_s4 = inlined_call_operand.vmem [shape: f32[32,10], index: 4, kind: input, shape index: {}]   ;;  %s3755_s5 = inlined_call_operand.vmem [shape: f32[1,10], index: 5, kind: input, shape index: {}]   ;;  %s3756_s6 = inlined_call_operand.hbm [shape: f32[2,10], index: 6, kind: output, shape index: {}]  }
   0x1   :  { %v67_v0 = vld [vmem:[%s3751_s1 + $0x78] sm:$0xff]  ;;  %v66_v1 = vld [vmem:[%s3751_s1 + $0x70] sm:$0xff]  ;;  %v65_v2 = vld [vmem:[%s3751_s1 + $0x68] sm:$0xff]  ;;  %113 = vmatprep.subr.mxu0 %v3772_v3  ;;  %406 = vmatprep.subr.mxu1 %v3772_v3 }
   0x2   :  { %v2467_v4 = vand.u32 4294901760, %v67_v0  ;;  %v2469_v5 = vand.u32 4294901760, %v66_v1  ;;  %v2471_v6 = vand.u32 4294901760, %v65_v2  ;;  %v64_v7 = vld [vmem:[%s3751_s1 + $0x60] sm:$0xff]  ;;  %v63_v8 = vld [vmem:[%s3751_s1 + $0x58] sm:$0xff]  ;;  %v62_v9 = vld [vmem:[%s3751_s1 + $0x50] sm:$0xff] }
   0x3   :  { %v2483_v10 = vand.u32 4294901760, %v64_v7  ;;  %v2485_v11 = vand.u32 4294901760, %v63_v8  ;;  %v2487_v12 = vand.u32 4294901760, %v62_v9  ;;  %v61_v13 = vld [vmem:[%s3751_s1 + $0x48] sm:$0xff]  ;;  %v60_v14 = vld [vmem:[%s3751_s1 + $0x40] sm:$0xff]  ;;  %v59_v19 = vld [vmem:[%s3751_s1 + $0x38] sm:$0xff] }
   0x4   :  { %115 = vmatpush1.msra.mxu0 %v2467_v4  ;;  %v2497_v15 = vsub.f32 %v67_v0, %v2467_v4  ;;  %v2500_v16 = vsub.f32 %v66_v1, %v2469_v5  ;;  %v2502_v17 = vand.u32 4294901760, %v61_v13  ;;  %v2505_v18 = vsub.f32 %v65_v2, %v2471_v6  ;;  %v58_v29 = vld [vmem:[%s3751_s1 + $0x30] sm:$0xff]  ;;  %v57_v34 = vld [vmem:[%s3751_s1 + $0x28] sm:$0xff]  ;;  %v56_v36 = vld [vmem:[%s3751_s1 + $0x20] sm:$0xff] }
   0x5   :  { %116 = vmatprep.subr.mxu0 %v3772_v3  ;;  %v2512_v20 = vsub.f32 %v64_v7, %v2483_v10  ;;  %v2515_v21 = vsub.f32 %v63_v8, %v2485_v11  ;;  %v2521_v25 = vand.u32 4294901760, %v60_v14  ;;  %v2525_v27 = vand.u32 4294901760, %v59_v19  ;;  %v55_v45 = vld [vmem:[%s3751_s1 + $0x18] sm:$0xff]  ;;  %v54_v52 = vld [vmem:[%s3751_s1 + $0x10] sm:$0xff]  ;;  %v25_v57 = vld [vmem:[%s3750_s0 + $0x8] sm:$0xff] }
   0x6   :  { %118 = vmatpush1.msra.mxu0 %v2469_v5  ;;  %v3769_v22 = vand.u32 4294901760, %v2497_v15  ;;  %v3768_v23 = vand.u32 4294901760, %v2500_v16  ;;  %v3767_v24 = vand.u32 4294901760, %v2505_v18  ;;  %v2532_v30 = vsub.f32 %v62_v9, %v2487_v12  ;;  %v53_v63 = vld [vmem:[%s3751_s1 + $0x8] sm:$0xff]  ;;  %v24_v0 = vld [vmem:[%s3750_s0] sm:$0xff] }
   0x7   :  { %119 = vmatprep.subr.mxu0 %v3772_v3  ;;  %v3765_v26 = vand.u32 4294901760, %v2512_v20  ;;  %v3764_v28 = vand.u32 4294901760, %v2515_v21  ;;  %v2548_v35 = vsub.f32 %v61_v13, %v2502_v17  ;;  %v2559_v41 = vand.u32 4294901760, %v58_v29 }
   0x8   :  { %121 = vmatpush1.msra.mxu0 %v2471_v6  ;;  %v410_v31 = vsub.f32 %v2497_v15, %v3769_v22  ;;  %v417_v32 = vsub.f32 %v2500_v16, %v3768_v23  ;;  %v424_v33 = vsub.f32 %v2505_v18, %v3767_v24  ;;  %v3763_v37 = vand.u32 4294901760, %v2532_v30 }
   0x9   :  { %122 = vmatprep.subr.mxu0 %v3772_v3  ;;  %v431_v40 = vsub.f32 %v2512_v20, %v3765_v26  ;;  %v2562_v42 = vand.u32 4294901760, %v57_v34  ;;  %v2564_v43 = vand.u32 4294901760, %v56_v36  ;;  %v2567_v44 = vsub.f32 %v60_v14, %v2521_v25 }
   0xa   :  { %124 = vmatpush1.msra.mxu0 %v2483_v10  ;;  %v411_v38 = vand.u32 4294901760, %v410_v31  ;;  %v418_v39 = vand.u32 4294901760, %v417_v32  ;;  %v425_v46 = vand.u32 4294901760, %v424_v33  ;;  %v438_v47 = vsub.f32 %v2515_v21, %v3764_v28 }
   0xb   :  { %125 = vmatprep.subr.mxu0 %v3772_v3  ;;  %v3762_v48 = vand.u32 4294901760, %v2548_v35  ;;  %v2578_v49 = vsub.f32 %v59_v19, %v2525_v27  ;;  %v445_v50 = vsub.f32 %v2532_v30, %v3763_v37  ;;  %v3759_v51 = vand.u32 4294901760, %v2567_v44 }
   0xc   :  { %127 = vmatpush1.msra.mxu0 %v2485_v11  ;;  %412 = vmatpush1.msra.mxu1 %v411_v38  ;;  %v432_v53 = vand.u32 4294901760, %v431_v40  ;;  %v2590_v54 = vand.u32 4294901760, %v55_v45  ;;  %v2594_v56 = vsub.f32 %v58_v29, %v2559_v41  ;;  %v2602_v58 = vsub.f32 %v57_v34, %v2562_v42 }
   0xd   :  { %128 = vmatprep.subr.mxu0 %v3772_v3  ;;  %413 = vmatprep.subr.mxu1 %v3772_v3  ;;  %v3758_v55 = vand.u32 4294901760, %v2578_v49  ;;  %v2605_v59 = vsub.f32 %v56_v36, %v2564_v43  ;;  %v439_v60 = vand.u32 4294901760, %v438_v47  ;;  %v452_v61 = vsub.f32 %v2548_v35, %v3762_v48 }
   0xe   :  { %130 = vmatpush1.msra.mxu0 %v2487_v12  ;;  %419 = vmatpush1.msra.mxu1 %v418_v39  ;;  %3878 = vst [vmem:[#allocation5_spill] sm:$0xff] %v2590_v54  ;;  %v2611_v62 = vand.u32 4294901760, %v54_v52  ;;  %v446_v1 = vand.u32 4294901760, %v445_v50  ;;  %v459_v2 = vsub.f32 %v2567_v44, %v3759_v51  ;;  %v72_v7 = vsel %vm70_vm0, %v25_v57, 0 }
   0xf   :  { %131 = vmatprep.subr.mxu0 %v3772_v3  ;;  %420 = vmatprep.subr.mxu1 %v3772_v3 }
  0x10   :  { %133 = vmatpush1.msra.mxu0 %v2502_v17  ;;  %426 = vmatpush1.msra.mxu1 %v425_v46  ;;  %3879 = vst [vmem:[#allocation6_spill] sm:$0xff] %v2611_v62 }
  0x11   :  { %134 = vmatprep.subr.mxu0 %v3772_v3  ;;  %427 = vmatprep.subr.mxu1 %v3772_v3 }
  0x12   :  { %11 = vsyncpa [#allocation3], 0  ;;  %136 = vmatpush1.msra.mxu0 %v2521_v25  ;;  %433 = vmatpush1.msra.mxu1 %v432_v53  ;;  %v2629_v8 = vsub.f32 %v2578_v49, %v3758_v55  ;;  %v3757_v9 = vand.u32 4294901760, %v2594_v56  ;;  %v52_v13 = vld [vmem:[%s3751_s1] sm:$0xff]  ;;  %v2636_v14 = vsub.f32 %v55_v45, %v2590_v54  ;;  %v2638_v19 = vand.u32 4294901760, %v72_v7  ;;  %v27_v29 = vld [vmem:[%s3750_s0 + $0x18] sm:$0xff] }
  0x13   :  { %137 = vmatprep.subr.mxu0 %v3772_v3  ;;  %434 = vmatprep.subr.mxu1 %v3772_v3  ;;  %v2645_v31 = vand.u32 4294901760, %v53_v63  ;;  %v3760_v32 = vand.u32 4294901760, %v2602_v58  ;;  %v3761_v33 = vand.u32 4294901760, %v2605_v59  ;;  %v2649_v34 = vand.u32 4294901760, %v24_v0  ;;  %v26_v40 = vld [vmem:[%s3750_s0 + $0x10] sm:$0xff]  ;;  %v31_v26 = vld [vmem:[%s3750_s0 + $0x38] sm:$0xff] }
  0x14   :  { %3880 = vst [vmem:[#allocation7_spill] sm:$0xff] %v2638_v19  ;;  %139 = vmatpush1.msra.mxu0 %v2525_v27  ;;  %440 = vmatpush1.msra.mxu1 %v439_v60  ;;  %v453_v36 = vand.u32 4294901760, %v452_v61  ;;  %v2653_v38 = vsub.f32 %v72_v7, %v2638_v19  ;;  %v2656_v39 = vsub.f32 %v54_v52, %v2611_v62  ;;  %v460_v45 = vand.u32 4294901760, %v459_v2  ;;  %v29_v52 = vld [vmem:[%s3750_s0 + $0x28] sm:$0xff] }
  0x15   :  { %3881 = vst [vmem:[#allocation8_spill] sm:$0xff] %v2645_v31  ;;  %3882 = vst [vmem:[#allocation9_spill] sm:$0xff] %v2649_v34  ;;  %140 = vmatprep.subr.mxu0 %v3772_v3  ;;  %441 = vmatprep.subr.mxu1 %v3772_v3  ;;  %v2663_v46 = vand.u32 4294901760, %v52_v13  ;;  %v2666_v47 = vsub.f32 %v24_v0, %v2649_v34  ;;  %v75_v50 = vsel %vm70_vm0, %v27_v29, 0  ;;  %v467_v53 = vand.u32 4294901760, %v2629_v8  ;;  %v69_v60 = vld [vmem:[%s3751_s1 + $0x88] sm:$0xff] }
  0x16   :  { %3883 = vst [vmem:[#allocation10_spill] sm:$0xff] %v2653_v38  ;;  %3884 = vst [vmem:[#allocation11_spill] sm:$0xff] %v2656_v39  ;;  %142 = vmatpush1.msra.mxu0 %v2559_v41  ;;  %447 = vmatpush1.msra.mxu1 %v446_v1  ;;  %v473_v57 = vsub.f32 %v2594_v56, %v3757_v9  ;;  %v3766_v61 = vand.u32 4294901760, %v2636_v14  ;;  %v68_v0 = vld [vmem:[%s3751_s1 + $0x80] sm:$0xff]  ;;  %v2684_v2 = vand.u32 4294901760, %v75_v50  ;;  %v2699_v29 = vand.u32 4294901760, %v26_v40 }
  0x17   :  { %3885 = vst [vmem:[#allocation12_spill] sm:$0xff] %v2663_v46  ;;  %3886 = vst [vmem:[#allocation13_spill] sm:$0xff] %v2666_v47  ;;  %143 = vmatprep.subr.mxu0 %v3772_v3  ;;  %448 = vmatprep.subr.mxu1 %v3772_v3  ;;  %v480_v1 = vsub.f32 %v2602_v58, %v3760_v32  ;;  %v2694_v7 = vsub.f32 %v2605_v59, %v3761_v33  ;;  %v3771_v9 = vand.u32 4294901760, %v2653_v38  ;;  %vm2420_vm1 = vmmov 0  }
  0x18   :  { %3887 = vst [vmem:[#allocation14_spill] sm:$0xff] %v2684_v2  ;;  %v2697_v8 = vsub.f32 %v53_v63, %v2645_v31  ;;  %3889 = vst [vmem:[#allocation16_spill] sm:$0xff] %v2699_v29  ;;  %145 = vmatpush1.msra.mxu0 %v2562_v42  ;;  %454 = vmatpush1.msra.mxu1 %v453_v36  ;;  %v3770_v55 = vand.u32 4294901760, %v2656_v39  ;;  %v2705_v51 = vsub.f32 %v75_v50, %v2684_v2  ;;  %v28_v36 = vld [vmem:[%s3750_s0 + $0x20] sm:$0xff]  ;;  %vm1521_vm2 = vcmask 261120  }
  0x19   :  { %v78_v32 = vsel %vm70_vm0, %v29_v52, 0  ;;  %146 = vmatprep.subr.mxu0 %v3772_v3  ;;  %455 = vmatprep.subr.mxu1 %v3772_v3  ;;  %v2710_v63 = vand.u32 4294901760, %v69_v60  ;;  %v2712_v33 = vand.u32 4294901760, %v68_v0  ;;  %v3774_v48 = vand.u32 4294901760, %v2666_v47 }
  0x1a   :  { %3888 = vst [vmem:[#allocation15_spill] sm:$0xff] %v2697_v8  ;;  %3890 = vst [vmem:[#allocation17_spill] sm:$0xff] %v2705_v51  ;;  %148 = vmatpush1.msra.mxu0 %v2564_v43  ;;  %461 = vmatpush1.msra.mxu1 %v460_v45  ;;  %v474_v50 = vand.u32 4294901760, %v473_v57  ;;  %v2722_v52 = vsub.f32 %v2636_v14, %v3766_v61  ;;  %v2725_v37 = vsub.f32 %v52_v13, %v2663_v46  ;;  %vm1773_vm4 = vcmask 1041409  }
  0x1b   :  { %3891 = vst [vmem:[#allocation18_spill] sm:$0xff] %v2710_v63  ;;  %3892 = vst [vmem:[#allocation19_spill] sm:$0xff] %v2712_v33  ;;  %v2728_v28 = vsub.f32 %v26_v40, %v2699_v29  ;;  %149 = vmatprep.subr.mxu0 %v3772_v3  ;;  %462 = vmatprep.subr.mxu1 %v3772_v3  ;;  %v481_v45 = vand.u32 4294901760, %v480_v1  ;;  %v488_v57 = vand.u32 4294901760, %v2694_v7  ;;  %v2737_v24 = vand.u32 4294901760, %v78_v32  ;;  %v30_v7 = vld [vmem:[%s3750_s0 + $0x30] sm:$0xff] }
  0x1c   :  { %151 = vmatpush1.msra.mxu0 %v2590_v54  ;;  %468 = vmatpush1.msra.mxu1 %v467_v53  ;;  %v198_v13 = vsub.f32 %v2653_v38, %v3771_v9  ;;  %v2746_v40 = vsub.f32 %v2656_v39, %v3770_v55  ;;  %v2749_v23 = vand.u32 4294901760, %v28_v36  ;;  %v204_v53 = vsub.f32 %v2666_v47, %v3774_v48  ;;  %v33_v1 = vld [vmem:[%s3750_s0 + $0x48] sm:$0xff] }
  0x1d   :  { %3893 = vst [vmem:[#allocation20_spill] sm:$0xff] %v2728_v28  ;;  %3894 = vst [vmem:[#allocation21_spill] sm:$0xff] %v2737_v24  ;;  %152 = vmatprep.subr.mxu0 %v3772_v3  ;;  %469 = vmatprep.subr.mxu1 %v3772_v3  ;;  %v2760_v22 = vsub.f32 %v69_v60, %v2710_v63  ;;  %v2763_v55 = vsub.f32 %v78_v32, %v2737_v24  ;;  %v81_v9 = vsel %vm70_vm0, %v31_v26, 0  ;;  %v3898_v32 = vmov 0.0  }
  0x1e   :  { %3895 = vst [vmem:[#allocation22_spill] sm:$0xff] %v2749_v23  ;;  %154 = vmatpush1.msra.mxu0 %v2611_v62  ;;  %475 = vmatpush1.msra.mxu1 %v474_v50  ;;  %v495_v61 = vand.u32 4294901760, %v2722_v52  ;;  %v2774_v60 = vsub.f32 %v68_v0, %v2712_v33  ;;  %v3899_v26 = vand.u32 4294901760, %v2697_v8  ;;  %v2782_v38 = vsub.f32 %v28_v36, %v2749_v23  ;;  %v32_v36 = vld [vmem:[%s3750_s0 + $0x40] sm:$0xff] }
  0x1f   :  { %3896 = vst [vmem:[#allocation23_spill] sm:$0xff] %v2760_v22  ;;  %3897 = vst [vmem:[#allocation24_spill] sm:$0xff] %v2763_v55  ;;  %155 = vmatprep.subr.mxu0 %v3898_v32  ;;  %476 = vmatprep.subr.mxu1 %v3898_v32  ;;  %v2784_v50 = vand.u32 4294901760, %v81_v9  ;;  %v2786_v52 = vand.u32 4294901760, %v30_v7  ;;  %v502_v0 = vand.u32 4294901760, %v2746_v40  ;;  %v3902_v48 = vand.u32 4294901760, %v2705_v51 }
  0x20   :  { %v508_v47 = vsub.f32 %v2697_v8, %v3899_v26  ;;  %157 = vmatpush1.msra.mxu0 %v2645_v31  ;;  %482 = vmatpush1.msra.mxu1 %v481_v45  ;;  %v84_v26 = vsel %vm70_vm0, %v33_v1, 0  ;;  %v35_v8 = vld [vmem:[%s3750_s0 + $0x58] sm:$0xff]  ;;  %v199_v45 = vand.u32 4294901760, %v198_v13  ;;  %v205_v40 = vand.u32 4294901760, %v204_v53 }
  0x21   :  { %3900 = vst [vmem:[#allocation25_spill] sm:$0xff] %v2784_v50  ;;  %3901 = vst [vmem:[#allocation26_spill] sm:$0xff] %v2786_v52  ;;  %v213_v3 = vsub.f32 %v2705_v51, %v3902_v48  ;;  %158 = vmatprep.subr.mxu0 %v3898_v32  ;;  %483 = vmatprep.subr.mxu1 %v3898_v32  ;;  %v2805_v62 = vsub.f32 %v81_v9, %v2784_v50  ;;  %v3903_v1 = vand.u32 4294901760, %v2725_v37  ;;  %vm2262_vm5 = vcmask 74752  }
  0x22   :  { %160 = vmatpush1.msra.mxu0 %v2663_v46  ;;  %489 = vmatpush1.msra.mxu1 %v488_v57  ;;  %v3904_v31 = vand.u32 4294901760, %v2728_v28  ;;  %v2815_v13 = vand.u32 4294901760, %v84_v26  ;;  %v2821_v57 = vsub.f32 %v30_v7, %v2786_v52  ;;  %v2823_v53 = vand.u32 4294901760, %v32_v36 }
  0x23   :  { %v515_v51 = vsub.f32 %v2725_v37, %v3903_v1  ;;  %189 = vmatprep.subr.mxu0 %v3898_v32  ;;  %490 = vmatprep.subr.mxu1 %v3898_v32  ;;  %v87_v1 = vsel %vm70_vm0, %v35_v8, 0  ;;  %v3907_v39 = vand.u32 4294901760, %v2763_v55  ;;  %v509_v9 = vand.u32 4294901760, %v508_v47 }
  0x24   :  { %v219_v54 = vsub.f32 %v2728_v28, %v3904_v31  ;;  %3905 = vst [vmem:[#allocation27_spill] sm:$0xff] %v2815_v13  ;;  %3906 = vst [vmem:[#allocation28_spill] sm:$0xff] %v2823_v53  ;;  %191 = vmatpush2.msra.mxu0 %v2710_v63  ;;  %496 = vmatpush1.msra.mxu1 %v495_v61  ;;  %v214_v31 = vand.u32 4294901760, %v213_v3  ;;  %v3908_v7 = vand.u32 4294901760, %v2760_v22  ;;  %v34_v61 = vld [vmem:[%s3750_s0 + $0x50] sm:$0xff]  ;;  %v37_v3 = vld [vmem:[%s3750_s0 + $0x68] sm:$0xff] }
  0x25   :  { %v228_v48 = vsub.f32 %v2763_v55, %v3907_v39  ;;  %192 = vmatprep.subr.mxu0 %v3898_v32  ;;  %497 = vmatprep.subr.mxu1 %v3898_v32  ;;  %v516_v39 = vand.u32 4294901760, %v515_v51  ;;  %v3909_v47 = vand.u32 4294901760, %v2774_v60  ;;  %v2849_v46 = vand.u32 4294901760, %v87_v1 }
  0x26   :  { %v550_v28 = vsub.f32 %v2760_v22, %v3908_v7  ;;  %194 = vmatpush2.msra.mxu0 %v2712_v33  ;;  %200 = vmatprep.mubr.f32.mxu0 %v199_v45  ;;  %v2847_v7 = vsub.f32 %v84_v26, %v2815_v13  ;;  %v220_v55 = vand.u32 4294901760, %v219_v54  ;;  %v3911_v63 = vand.u32 4294901760, %v2782_v38 }
  0x27   :  { %v557_v8 = vsub.f32 %v2774_v60, %v3909_v47  ;;  %3910 = vst [vmem:[#allocation29_spill] sm:$0xff] %v2849_v46  ;;  %503 = vmatpush1.msra.mxu1 %v502_v0  ;;  %206 = vmatmul.mubr.f32.vlgmr.msra.gmra.mxu0 %v205_v40  ;;  %v3803_v33 = vand.u32 4294901760, %v2821_v57  ;;  %v2856_v51 = vsub.f32 %v32_v36, %v2823_v53  ;;  %v229_v45 = vand.u32 4294901760, %v228_v48 }
  0x28   :  { %v234_v22 = vsub.f32 %v2782_v38, %v3911_v63  ;;  %504 = vmatprep.subr.mxu1 %v3898_v32  ;;  %215 = vmatprep.mubr.f32.mxu0 %v214_v31  ;;  %v2859_v26 = vand.u32 4294901760, %v34_v61  ;;  %v90_v47 = vsel %vm70_vm0, %v37_v3, 0  ;;  %v551_v0 = vand.u32 4294901760, %v550_v28  ;;  %v36_v28 = vld [vmem:[%s3750_s0 + $0x60] sm:$0xff] }
  0x29   :  { %510 = vmatpush1.msra.mxu1 %v509_v9  ;;  %659 = vmatprep.subr.mxu0 %v3898_v32  ;;  %v3913_v54 = vand.u32 4294901760, %v2805_v62  ;;  %v558_v36 = vand.u32 4294901760, %v557_v8  ;;  %v3806_v40 = vand.u32 4294901760, %v2847_v7  ;;  %v2870_v48 = vsub.f32 %v87_v1, %v2849_v46  ;;  %v39_v9 = vld [vmem:[%s3750_s0 + $0x78] sm:$0xff] }
  0x2a   :  { %3912 = vst [vmem:[#allocation30_spill] sm:$0xff] %v2859_v26  ;;  %511 = vmatprep.subr.mxu1 %v3898_v32  ;;  %561 = vmatprep.mubr.f32.mxu1 %v2638_v19  ;;  %v235_v31 = vand.u32 4294901760, %v234_v22  ;;  %v249_v3 = vsub.f32 %v2821_v57, %v3803_v33  ;;  %v3807_v8 = vand.u32 4294901760, %v2856_v51  ;;  %v2886_v1 = vsub.f32 %v34_v61, %v2859_v26  ;;  %v38_v61 = vld [vmem:[%s3750_s0 + $0x70] sm:$0xff] }
  0x2b   :  { %v243_v63 = vsub.f32 %v2805_v62, %v3913_v54  ;;  %3914 = vst [vmem:[#allocation31_spill] sm:$0xff] %v2870_v48  ;;  %517 = vmatpush1.msra.mxu1 %v516_v39  ;;  %221 = vmatmul.mubr.f32.gmra.mxu0 %v220_v55  ;;  %v2882_v54 = vand.u32 4294901760, %v90_v47  ;;  %v2889_v55 = vand.u32 4294901760, %v36_v28  ;;  %v93_v22 = vsel %vm70_vm0, %v39_v9, 0 }
  0x2c   :  { %546 = vmatprep.subr.mxu1 %v3898_v32  ;;  %230 = vmatprep.mubr.f32.mxu0 %v229_v45  ;;  %3916 = vst [vmem:[#allocation33_spill] sm:$0xff] %v2886_v1  ;;  %v258_v33 = vsub.f32 %v2847_v7, %v3806_v40  ;;  %v264_v9 = vsub.f32 %v2856_v51, %v3807_v8  ;;  %v2913_v45 = vand.u32 4294901760, %v93_v22  ;;  %v3921_v8 = vand.u32 4294901760, %v2870_v48 }
  0x2d   :  { %3915 = vst [vmem:[#allocation32_spill] sm:$0xff] %v2882_v54  ;;  %552 = vmatpush2.msra.mxu1 %v551_v0  ;;  %662 = vmatpush1.msra.mxu0 %v2497_v15  ;;  %v244_v39 = vand.u32 4294901760, %v243_v63  ;;  %3917 = vst [vmem:[#allocation34_spill] sm:$0xff] %v2889_v55  ;;  %v41_v0 = vld [vmem:[%s3750_s0 + $0x88] sm:$0xff]  ;;  %v250_v63 = vand.u32 4294901760, %v249_v3  ;;  %v2908_v19 = vsub.f32 %v90_v47, %v2882_v54 }
  0x2e   :  { %553 = vmatprep.subr.mxu1 %v3898_v32  ;;  %663 = vmatprep.subr.mxu0 %v3898_v32  ;;  %3919 = vst [vmem:[#allocation36_spill] sm:$0xff] %v2913_v45  ;;  %v96_v3 = vsel %vm70_vm0, %v41_v0, 0  ;;  %v259_v47 = vand.u32 4294901760, %v258_v33  ;;  %v273_v40 = vsub.f32 %v2870_v48, %v3921_v8  ;;  %v43_v0 = vld [vmem:[%s3750_s0 + $0x98] sm:$0xff]  ;;  %v3922_v33 = vand.u32 4294901760, %v2886_v1 }
  0x2f   :  { %559 = vmatpush2.msra.mxu1 %v558_v36  ;;  %236 = vmatmul.mubr.f32.gmra.mxu0 %v235_v31  ;;  %3918 = vst [vmem:[#allocation35_spill] sm:$0xff] %v2908_v19  ;;  %v2917_v36 = vsub.f32 %v36_v28, %v2889_v55  ;;  %v2919_v31 = vand.u32 4294901760, %v38_v61 }
  0x30   :  { %563 = vmatmul.mubr.f32.vlgmr.msra.gmra.mxu1 %v2649_v34  ;;  %886 = vmatprep.subr.mxu1 %v3898_v32  ;;  %v40_v34 = vld [vmem:[%s3750_s0 + $0x80] sm:$0xff]  ;;  %v279_v8 = vsub.f32 %v2886_v1, %v3922_v33  ;;  %v3925_v33 = vand.u32 4294901760, %v2908_v19 }
  0x31   :  { %888 = vmatpush1.msra.mxu1 %v2467_v4  ;;  %245 = vmatprep.mubr.f32.mxu0 %v244_v39  ;;  %3920 = vst [vmem:[#allocation37_spill] sm:$0xff] %v2917_v36  ;;  %v265_v39 = vand.u32 4294901760, %v264_v9  ;;  %v2943_v9 = vand.u32 4294901760, %v96_v3  ;;  %v3824_v28 = vand.u32 4294901760, %v2917_v36  ;;  %v2952_v48 = vand.u32 4294901760, %v40_v34 }
  0x32   :  { %568 = vmatprep.mubr.f32.mxu1 %v2684_v2  ;;  %666 = vmatpush1.msra.mxu0 %v2500_v16  ;;  %v2949_v2 = vsub.f32 %v38_v61, %v2919_v31  ;;  %v288_v1 = vsub.f32 %v2908_v19, %v3925_v33  ;;  %v45_v61 = vld [vmem:[%s3750_s0 + $0xa8] sm:$0xff] }
  0x33   :  { %251 = vmatmul.mubr.f32.gmra.mxu0 %v250_v63  ;;  %889 = vmatprep.subr.mxu1 %v3898_v32  ;;  %v2941_v63 = vsub.f32 %v93_v22, %v2913_v45  ;;  %v99_v22 = vsel %vm70_vm0, %v43_v0, 0  ;;  %v2966_v0 = vsub.f32 %v96_v3, %v2943_v9  ;;  %v294_v33 = vsub.f32 %v2917_v36, %v3824_v28 }
  0x34   :  { %570 = vmatmul.mubr.f32.gmra.mxu1 %v2699_v29  ;;  %667 = vmatprep.subr.mxu0 %v3898_v32  ;;  %3924 = vst [vmem:[#allocation39_spill] sm:$0xff] %v2949_v2  ;;  %v274_v29 = vand.u32 4294901760, %v273_v40  ;;  %v280_v40 = vand.u32 4294901760, %v279_v8  ;;  %v2977_v8 = vand.u32 4294901760, %v99_v22  ;;  %v2981_v3 = vsub.f32 %v40_v34, %v2952_v48  ;;  %v44_v34 = vld [vmem:[%s3750_s0 + $0xa0] sm:$0xff] }
  0x35   :  { %3923 = vst [vmem:[#allocation38_spill] sm:$0xff] %v2941_v63  ;;  %891 = vmatpush1.msra.mxu1 %v2469_v5  ;;  %670 = vmatpush1.msra.mxu0 %v2505_v18  ;;  %3926 = vst [vmem:[#allocation40_spill] sm:$0xff] %v2966_v0  ;;  %v3929_v28 = vand.u32 4294901760, %v2941_v63 }
  0x36   :  { %260 = vmatprep.mubr.f32.mxu0 %v259_v47  ;;  %575 = vmatprep.mubr.f32.mxu1 %v2737_v24  ;;  %3927 = vst [vmem:[#allocation41_spill] sm:$0xff] %v2981_v3  ;;  %v102_v47 = vsel %vm70_vm0, %v45_v61, 0  ;;  %v289_v24 = vand.u32 4294901760, %v288_v1  ;;  %v47_v61 = vld [vmem:[%s3750_s0 + $0xb8] sm:$0xff]  ;;  %v295_v1 = vand.u32 4294901760, %v294_v33 }
  0x37   :  { %892 = vmatprep.subr.mxu1 %v3898_v32  ;;  %266 = vmatmul.mubr.f32.gmra.mxu0 %v265_v39  ;;  %v42_v39 = vld [vmem:[%s3750_s0 + $0x90] sm:$0xff] }
  0x38   :  { %577 = vmatmul.mubr.f32.gmra.mxu1 %v2749_v23  ;;  %671 = vmatprep.subr.mxu0 %v3898_v32  ;;  %v2986_v19 = vand.u32 4294901760, %v42_v39  ;;  %v303_v23 = vsub.f32 %v2941_v63, %v3929_v28  ;;  %v3005_v28 = vsub.f32 %v99_v22, %v2977_v8 }
  0x39   :  { %894 = vmatpush1.msra.mxu1 %v2471_v6  ;;  %674 = vmatpush1.msra.mxu0 %v2512_v20 }
  0x3a   :  { %895 = vmatprep.subr.mxu1 %v3898_v32  ;;  %275 = vmatprep.mubr.f32.mxu0 %v274_v29  ;;  %3928 = vst [vmem:[#allocation42_spill] sm:$0xff] %v2986_v19  ;;  %3931 = vst [vmem:[#allocation43_spill] sm:$0xff] %v3005_v28  ;;  %v3007_v29 = vand.u32 4294901760, %v102_v47  ;;  %v3014_v33 = vsub.f32 %v42_v39, %v2986_v19  ;;  %v304_v22 = vand.u32 4294901760, %v303_v23  ;;  %v49_v23 = vld [vmem:[%s3750_s0 + $0xc8] sm:$0xff] }
  0x3b   :  { %582 = vmatprep.mubr.f32.mxu1 %v2784_v50  ;;  %675 = vmatprep.subr.mxu0 %v3898_v32 }
  0x3c   :  { %897 = vmatpush1.msra.mxu1 %v2483_v10  ;;  %281 = vmatmul.mubr.f32.gmra.mxu0 %v280_v40  ;;  %v3930_v40 = vand.u32 4294901760, %v2949_v2 }
  0x3d   :  { %584 = vmatmul.mubr.f32.gmra.mxu1 %v2786_v52  ;;  %678 = vmatpush1.msra.mxu0 %v2515_v21  ;;  %v3016_v52 = vand.u32 4294901760, %v44_v34 }
  0x3e   :  { %v309_v50 = vsub.f32 %v2949_v2, %v3930_v40  ;;  %898 = vmatprep.subr.mxu1 %v3898_v32  ;;  %679 = vmatprep.subr.mxu0 %v3898_v32  ;;  %v105_v40 = vsel %vm70_vm0, %v47_v61, 0  ;;  %v3933_v2 = vand.u32 4294901760, %v2966_v0  ;;  %v3030_v61 = vsub.f32 %v102_v47, %v3007_v29 }
  0x3f   :  { %900 = vmatpush1.msra.mxu1 %v2485_v11  ;;  %290 = vmatprep.mubr.f32.mxu0 %v289_v24  ;;  %3932 = vst [vmem:[#allocation44_spill] sm:$0xff] %v3016_v52  ;;  %v46_v24 = vld [vmem:[%s3750_s0 + $0xb0] sm:$0xff]  ;;  %v3046_v47 = vsub.f32 %v44_v34, %v3016_v52 }
  0x40   :  { %589 = vmatprep.mubr.f32.mxu1 %v2815_v13  ;;  %682 = vmatpush1.msra.mxu0 %v2532_v30  ;;  %v318_v36 = vsub.f32 %v2966_v0, %v3933_v2  ;;  %v310_v39 = vand.u32 4294901760, %v309_v50  ;;  %3934 = vst [vmem:[#allocation45_spill] sm:$0xff] %v3030_v61  ;;  %v3935_v2 = vand.u32 4294901760, %v2981_v3  ;;  %v3040_v13 = vand.u32 4294901760, %v105_v40 }
  0x41   :  { %296 = vmatmul.mubr.f32.gmra.mxu0 %v295_v1  ;;  %591 = vmatmul.mubr.f32.gmra.mxu1 %v2823_v53  ;;  %v3048_v63 = vand.u32 4294901760, %v46_v24  ;;  %v108_v0 = vsel %vm70_vm0, %v49_v23, 0  ;;  %v3939_v23 = vand.u32 4294901760, %v3014_v33 }
  0x42   :  { %901 = vmatprep.subr.mxu1 %v3898_v32  ;;  %683 = vmatprep.subr.mxu0 %v3898_v32  ;;  %v324_v1 = vsub.f32 %v2981_v3, %v3935_v2  ;;  %3936 = vst [vmem:[#allocation46_spill] sm:$0xff] %v3040_v13  ;;  %v319_v53 = vand.u32 4294901760, %v318_v36  ;;  %v3938_v2 = vand.u32 4294901760, %v3005_v28  ;;  %v48_v36 = vld [vmem:[%s3750_s0 + $0xc0] sm:$0xff]  ;;  %v3077_v50 = vand.u32 4294901760, %v108_v0 }
  0x43   :  { %903 = vmatpush1.msra.mxu1 %v2487_v12  ;;  %686 = vmatpush1.msra.mxu0 %v2548_v35  ;;  %3937 = vst [vmem:[#allocation47_spill] sm:$0xff] %v3048_v63 }
  0x44   :  { %305 = vmatprep.mubr.f32.mxu0 %v304_v22  ;;  %596 = vmatprep.mubr.f32.mxu1 %v2849_v46  ;;  %v333_v3 = vsub.f32 %v3005_v28, %v3938_v2  ;;  %v325_v34 = vand.u32 4294901760, %v324_v1  ;;  %v3060_v22 = vsub.f32 %v105_v40, %v3040_v13  ;;  %v339_v2 = vsub.f32 %v3014_v33, %v3939_v23 }
  0x45   :  { %904 = vmatprep.subr.mxu1 %v3898_v32  ;;  %311 = vmatmul.mubr.f32.gmra.mxu0 %v310_v39  ;;  %v51_v39 = vld [vmem:[%s3750_s0 + $0xd8] sm:$0xff]  ;;  %v3075_v40 = vsub.f32 %v46_v24, %v3048_v63  ;;  %3940 = vst [vmem:[#allocation48_spill] sm:$0xff] %v3077_v50  ;;  %v3941_v46 = vand.u32 4294901760, %v3030_v61  ;;  %v3085_v23 = vand.u32 4294901760, %v48_v36 }
  0x46   :  { %598 = vmatmul.mubr.f32.gmra.mxu1 %v2859_v26  ;;  %687 = vmatprep.subr.mxu0 %v3898_v32  ;;  %v334_v26 = vand.u32 4294901760, %v333_v3  ;;  %v111_v1 = vsel %vm70_vm0, %v51_v39, 0  ;;  %v3857_v24 = vand.u32 4294901760, %v3060_v22  ;;  %v3943_v3 = vand.u32 4294901760, %v3046_v47 }
  0x47   :  { %906 = vmatpush1.msra.mxu1 %v2502_v17  ;;  %690 = vmatpush1.msra.mxu0 %v2567_v44  ;;  %v348_v28 = vsub.f32 %v3030_v61, %v3941_v46  ;;  %3942 = vst [vmem:[#allocation49_spill] sm:$0xff] %v3085_v23  ;;  %v3097_v61 = vsub.f32 %v108_v0, %v3077_v50  ;;  %v3104_v39 = vand.u32 4294901760, %v111_v1 }
  0x48   :  { %907 = vmatprep.subr.mxu1 %v3898_v32  ;;  %320 = vmatprep.mubr.f32.mxu0 %v319_v53  ;;  %v340_v53 = vand.u32 4294901760, %v339_v2  ;;  %v363_v0 = vsub.f32 %v3060_v22, %v3857_v24 }
  0x49   :  { %603 = vmatprep.mubr.f32.mxu1 %v2882_v54  ;;  %691 = vmatprep.subr.mxu0 %v3898_v32  ;;  %v354_v54 = vsub.f32 %v3046_v47, %v3943_v3  ;;  %3944 = vst [vmem:[#allocation50_spill] sm:$0xff] %v3104_v39  ;;  %v349_v2 = vand.u32 4294901760, %v348_v28  ;;  %v3108_v3 = vsub.f32 %v48_v36, %v3085_v23  ;;  %v3860_v36 = vand.u32 4294901760, %v3097_v61 }
  0x4a   :  { %909 = vmatpush1.msra.mxu1 %v2521_v25  ;;  %326 = vmatmul.mubr.f32.gmra.mxu0 %v325_v34  ;;  %v50_v34 = vld [vmem:[%s3750_s0 + $0xd0] sm:$0xff] }
  0x4b   :  { %605 = vmatmul.mubr.f32.gmra.mxu1 %v2889_v55  ;;  %694 = vmatpush1.msra.mxu0 %v2578_v49  ;;  %v3115_v46 = vand.u32 4294901760, %v50_v34  ;;  %v355_v55 = vand.u32 4294901760, %v354_v54  ;;  %v364_v54 = vand.u32 4294901760, %v363_v0 }
  0x4c   :  { %910 = vmatprep.subr.mxu1 %v3898_v32  ;;  %695 = vmatprep.subr.mxu0 %v3898_v32 }
  0x4d   :  { %912 = vmatpush1.msra.mxu1 %v2525_v27  ;;  %335 = vmatprep.mubr.f32.mxu0 %v334_v26  ;;  %3945 = vst [vmem:[#allocation51_spill] sm:$0xff] %v3115_v46  ;;  %v3946_v26 = vand.u32 4294901760, %v3075_v40 }
  0x4e   :  { %610 = vmatprep.mubr.f32.mxu1 %v2913_v45  ;;  %698 = vmatpush1.msra.mxu0 %v2594_v56  ;;  %v3125_v45 = vsub.f32 %v111_v1, %v3104_v39  ;;  %v378_v1 = vsub.f32 %v3097_v61, %v3860_v36  ;;  %v3949_v36 = vld [vmem:[#allocation15_spill] sm:$0xff] }
  0x4f   :  { %341 = vmatmul.mubr.f32.gmra.mxu0 %v340_v53  ;;  %612 = vmatmul.mubr.f32.gmra.mxu1 %v2919_v31  ;;  %v369_v28 = vsub.f32 %v3075_v40, %v3946_v26  ;;  %v3858_v53 = vand.u32 4294901760, %v3108_v3  ;;  %v3132_v26 = vsub.f32 %v50_v34, %v3115_v46 }
  0x50   :  { %913 = vmatprep.subr.mxu1 %v3898_v32  ;;  %699 = vmatprep.subr.mxu0 %v3898_v32  ;;  %v379_v0 = vand.u32 4294901760, %v378_v1  ;;  %v3947_v1 = vld [vmem:[#allocation11_spill] sm:$0xff] }
  0x51   :  { %915 = vmatpush1.msra.mxu1 %v2559_v41  ;;  %350 = vmatprep.mubr.f32.mxu0 %v349_v2  ;;  %v370_v24 = vand.u32 4294901760, %v369_v28  ;;  %v3859_v2 = vand.u32 4294901760, %v3125_v45  ;;  %v3863_v34 = vand.u32 4294901760, %v3132_v26 }
  0x52   :  { %617 = vmatprep.mubr.f32.mxu1 %v2943_v9  ;;  %702 = vmatpush1.msra.mxu0 %v2602_v58 }
  0x53   :  { %356 = vmatmul.mubr.f32.gmra.mxu0 %v355_v55  ;;  %619 = vmatmul.mubr.f32.gmra.mxu1 %v2952_v48  ;;  %v384_v55 = vsub.f32 %v3108_v3, %v3858_v53  ;;  %v393_v28 = vsub.f32 %v3125_v45, %v3859_v2  ;;  %v3948_v53 = vld [vmem:[#allocation5_spill] sm:$0xff] }
  0x54   :  { %916 = vmatprep.subr.mxu1 %v3898_v32  ;;  %703 = vmatprep.subr.mxu0 %v3898_v32 }
  0x55   :  { %918 = vmatpush1.msra.mxu1 %v2562_v42  ;;  %706 = vmatpush1.msra.mxu0 %v2605_v59  ;;  %v394_v2 = vand.u32 4294901760, %v393_v28  ;;  %v3952_v28 = vld [vmem:[#allocation8_spill] sm:$0xff] }
  0x56   :  { %365 = vmatprep.mubr.f32.mxu0 %v364_v54  ;;  %624 = vmatprep.mubr.f32.mxu1 %v2977_v8  ;;  %v385_v54 = vand.u32 4294901760, %v384_v55 }
  0x57   :  { %919 = vmatprep.subr.mxu1 %v3898_v32  ;;  %371 = vmatmul.mubr.f32.gmra.mxu0 %v370_v24  ;;  %v399_v24 = vsub.f32 %v3132_v26, %v3863_v34  ;;  %v3957_v34 = vld [vmem:[#allocation18_spill] sm:$0xff] }
  0x58   :  { %626 = vmatmul.mubr.f32.gmra.mxu1 %v2986_v19  ;;  %707 = vmatprep.subr.mxu0 %v3898_v32  ;;  %v3950_v19 = vld [vmem:[#allocation6_spill] sm:$0xff] }
  0x59   :  { %921 = vmatpush1.msra.mxu1 %v2564_v43  ;;  %710 = vmatpush1.msra.mxu0 %v2636_v14  ;;  %v400_v55 = vand.u32 4294901760, %v399_v24  ;;  %v3955_v24 = vld [vmem:[#allocation12_spill] sm:$0xff] }
  0x5a   :  { %711 = vmatprep.subr.mxu0 %v3898_v32  ;;  %922 = vmatprep.subr.mxu1 %v3898_v32 }
  0x5b   :  { %380 = vmatprep.mubr.f32.mxu0 %v379_v0  ;;  %631 = vmatprep.mubr.f32.mxu1 %v3007_v29  ;;  %v3951_v0 = vld [vmem:[#allocation23_spill] sm:$0xff] }
  0x5c   :  { %714 = vmatpush1.msra.mxu0 %v3947_v1  ;;  %924 = vmatpush1.msra.mxu1 %v3948_v53 }
  0x5d   :  { %386 = vmatmul.mubr.f32.gmra.mxu0 %v385_v54  ;;  %633 = vmatmul.mubr.f32.gmra.mxu1 %v3016_v52  ;;  %v3954_v54 = vld [vmem:[#allocation13_spill] sm:$0xff] }
  0x5e   :  { %715 = vmatprep.subr.mxu0 %v3898_v32  ;;  %925 = vmatprep.subr.mxu1 %v3898_v32  ;;  %v3963_v52 = vand.u32 4294901760, %v3954_v54 }
  0x5f   :  { %718 = vmatpush1.msra.mxu0 %v3949_v36  ;;  %927 = vmatpush1.msra.mxu1 %v3950_v19 }
  0x60   :  { %719 = vmatprep.subr.mxu0 %v3898_v32  ;;  %395 = vmatprep.mubr.f32.mxu0 %v394_v2  ;;  %v3953_v2 = vld [vmem:[#allocation10_spill] sm:$0xff] }
  0x61   :  { %638 = vmatprep.mubr.f32.mxu1 %v3040_v13  ;;  %722 = vmatpush1.msra.mxu0 %v2725_v37  ;;  %v3961_v13 = vand.u32 4294901760, %v3953_v2 }
  0x62   :  { %401 = vmatmul.mubr.f32.gmra.mxu0 %v400_v55  ;;  %640 = vmatmul.mubr.f32.gmra.mxu1 %v3048_v63  ;;  %v3956_v55 = vld [vmem:[#allocation17_spill] sm:$0xff]  ;;  %v3959_v63 = vld [vmem:[#allocation19_spill] sm:$0xff] }
  0x63   :  { %751 = vmatprep.subr.mxu0 %v3898_v32  ;;  %928 = vmatprep.subr.mxu1 %v3898_v32 }
  0x64   :  { %754 = vmatpush2.msra.mxu0 %v3951_v0  ;;  %930 = vmatpush1.msra.mxu1 %v3952_v28 }
  0x65   :  { %755 = vmatprep.subr.mxu0 %v3898_v32  ;;  %645 = vmatprep.mubr.f32.mxu1 %v3077_v50  ;;  %v3958_v50 = vld [vmem:[#allocation20_spill] sm:$0xff] }
  0x66   :  { %758 = vmatpush2.msra.mxu0 %v2774_v60  ;;  %761 = vmatprep.mubr.f32.mxu0 %v3953_v2  ;;  %v3989_v2 = vld [vmem:[#allocation41_spill] sm:$0xff] }
  0x67   :  { %931 = vmatprep.subr.mxu1 %v3898_v32  ;;  %647 = vmatmul.mubr.f32.gmra.mxu1 %v3085_v23  ;;  %v3960_v23 = vld [vmem:[#allocation24_spill] sm:$0xff] }
  0x68   :  { %764 = vmatmul.mubr.f32.vlgmr.msra.gmra.mxu0 %v3954_v54  ;;  %933 = vmatpush1.msra.mxu1 %v3955_v24 }
  0x69   :  { %962 = vmatprep.subr.mxu1 %v3898_v32  ;;  %652 = vmatprep.mubr.f32.mxu1 %v3104_v39  ;;  %v3962_v39 = vand.u32 4294901760, %v2497_v15  ;;  %v3966_v15 = vand.u32 4294901760, %v3958_v50 }
  0x6a   :  { %770 = vmatprep.mubr.f32.mxu0 %v3956_v55  ;;  %964 = vmatpush2.msra.mxu1 %v3957_v34 }
  0x6b   :  { %654 = vmatmul.mubr.f32.gmra.mxu1 %v3115_v46  ;;  %965 = vmatprep.subr.mxu1 %v3898_v32  ;;  %v3964_v46 = vand.u32 4294901760, %v3956_v55 }
  0x6c   :  { %773 = vmatmul.mubr.f32.gmra.mxu0 %v3958_v50  ;;  %967 = vmatpush2.msra.mxu1 %v3959_v63  ;;  %v3972_v50 = vand.u32 4294901760, %v2805_v62 }
  0x6d   :  { %1123 = vmatprep.subr.mxu0 %v3898_v32  ;;  %779 = vmatprep.mubr.f32.mxu0 %v3960_v23 }
  0x6e   :  { %971 = vmatprep.mubr.f32.mxu1 %v3961_v13  ;;  %1127 = vmatpush1.msra.mxu0 %v3962_v39  ;;  %v3965_v13 = vand.u32 4294901760, %v2500_v16  ;;  %v3969_v16 = vand.u32 4294901760, %v2782_v38 }
  0x6f   :  { %975 = vmatmul.mubr.f32.vlgmr.msra.gmra.mxu1 %v3963_v52  ;;  %1340 = vmatprep.subr.mxu1 %v3898_v32  ;;  %v3968_v52 = vand.u32 4294901760, %v3960_v23  ;;  %v3974_v23 = vand.u32 4294901760, %v2821_v57 }
  0x70   :  { %782 = vmatmul.mubr.f32.gmra.mxu0 %v2782_v38  ;;  %1342 = vmatpush1.msra.mxu1 %v2467_v4  ;;  %v3967_v4 = vand.u32 4294901760, %v2505_v18  ;;  %v3971_v18 = vld [vmem:[#allocation31_spill] sm:$0xff]  ;;  %v3973_v38 = vld [vmem:[#allocation33_spill] sm:$0xff] }
  0x71   :  { %1128 = vmatprep.subr.mxu0 %v3898_v32  ;;  %788 = vmatprep.mubr.f32.mxu0 %v2805_v62  ;;  %v3977_v62 = vand.u32 4294901760, %v2847_v7 }
  0x72   :  { %982 = vmatprep.mubr.f32.mxu1 %v3964_v46  ;;  %1132 = vmatpush1.msra.mxu0 %v3965_v13  ;;  %v3979_v46 = vld [vmem:[#allocation37_spill] sm:$0xff] }
  0x73   :  { %986 = vmatmul.mubr.f32.gmra.mxu1 %v3966_v15  ;;  %1343 = vmatprep.subr.mxu1 %v3898_v32  ;;  %v3990_v54 = vand.u32 4294901760, %v3979_v46  ;;  %v3998_v15 = vand.u32 4294901760, %v2602_v58  ;;  %v4002_v58 = vand.u32 4294901760, %v3014_v33 }
  0x74   :  { %791 = vmatmul.mubr.f32.gmra.mxu0 %v2821_v57  ;;  %1133 = vmatprep.subr.mxu0 %v3898_v32  ;;  %v3980_v57 = vand.u32 4294901760, %v2856_v51 }
  0x75   :  { %1345 = vmatpush1.msra.mxu1 %v2469_v5  ;;  %1137 = vmatpush1.msra.mxu0 %v3967_v4  ;;  %v3970_v5 = vand.u32 4294901760, %v2512_v20  ;;  %v3976_v20 = vld [vmem:[#allocation35_spill] sm:$0xff] }
  0x76   :  { %797 = vmatprep.mubr.f32.mxu0 %v2847_v7  ;;  %993 = vmatprep.mubr.f32.mxu1 %v3968_v52  ;;  %v3983_v7 = vand.u32 4294901760, %v3971_v18  ;;  %v3988_v39 = vand.u32 4294901760, %v3976_v20  ;;  %v4005_v52 = vand.u32 4294901760, %v3947_v1  ;;  %v4016_v1 = vld [vmem:[#allocation9_spill] sm:$0xff] }
  0x77   :  { %1346 = vmatprep.subr.mxu1 %v3898_v32  ;;  %997 = vmatmul.mubr.f32.gmra.mxu1 %v3969_v16  ;;  %v4027_v16 = vld [vmem:[#allocation29_spill] sm:$0xff] }
  0x78   :  { %800 = vmatmul.mubr.f32.gmra.mxu0 %v2856_v51  ;;  %1138 = vmatprep.subr.mxu0 %v3898_v32  ;;  %v3985_v51 = vand.u32 4294901760, %v3973_v38 }
  0x79   :  { %1348 = vmatpush1.msra.mxu1 %v2471_v6  ;;  %1142 = vmatpush1.msra.mxu0 %v3970_v5  ;;  %v3975_v6 = vand.u32 4294901760, %v2515_v21  ;;  %v3982_v21 = vld [vmem:[#allocation38_spill] sm:$0xff] }
  0x7a   :  { %1349 = vmatprep.subr.mxu1 %v3898_v32  ;;  %806 = vmatprep.mubr.f32.mxu0 %v3971_v18  ;;  %v3993_v55 = vand.u32 4294901760, %v3982_v21  ;;  %v4028_v5 = vld [vmem:[#allocation30_spill] sm:$0xff]  ;;  %v4029_v18 = vld [vmem:[#allocation32_spill] sm:$0xff] }
  0x7b   :  { %1004 = vmatprep.mubr.f32.mxu1 %v3972_v50  ;;  %1143 = vmatprep.subr.mxu0 %v3898_v32  ;;  %v4030_v50 = vld [vmem:[#allocation34_spill] sm:$0xff] }
  0x7c   :  { %1351 = vmatpush1.msra.mxu1 %v2483_v10  ;;  %809 = vmatmul.mubr.f32.gmra.mxu0 %v3973_v38  ;;  %v3978_v10 = vand.u32 4294901760, %v2532_v30  ;;  %v3984_v30 = vld [vmem:[#allocation39_spill] sm:$0xff]  ;;  %v4031_v38 = vld [vmem:[#allocation36_spill] sm:$0xff] }
  0x7d   :  { %1008 = vmatmul.mubr.f32.gmra.mxu1 %v3974_v23  ;;  %1147 = vmatpush1.msra.mxu0 %v3975_v6  ;;  %v3995_v13 = vand.u32 4294901760, %v3984_v30  ;;  %v4032_v23 = vld [vmem:[#allocation42_spill] sm:$0xff]  ;;  %v4033_v6 = vld [vmem:[#allocation44_spill] sm:$0xff] }
  0x7e   :  { %1352 = vmatprep.subr.mxu1 %v3898_v32  ;;  %1148 = vmatprep.subr.mxu0 %v3898_v32 }
  0x7f   :  { %1354 = vmatpush1.msra.mxu1 %v2485_v11  ;;  %815 = vmatprep.mubr.f32.mxu0 %v3976_v20  ;;  %v3981_v11 = vand.u32 4294901760, %v2548_v35  ;;  %v3987_v35 = vld [vmem:[#allocation40_spill] sm:$0xff]  ;;  %v4034_v20 = vld [vmem:[#allocation46_spill] sm:$0xff] }
  0x80   :  { %1015 = vmatprep.mubr.f32.mxu1 %v3977_v62  ;;  %1152 = vmatpush1.msra.mxu0 %v3978_v10  ;;  %v4035_v62 = vld [vmem:[#allocation47_spill] sm:$0xff] }
  0x81   :  { %818 = vmatmul.mubr.f32.gmra.mxu0 %v3979_v46  ;;  %1019 = vmatmul.mubr.f32.gmra.mxu1 %v3980_v57 }
  0x82   :  { %1355 = vmatprep.subr.mxu1 %v3898_v32  ;;  %1153 = vmatprep.subr.mxu0 %v3898_v32 }
  0x83   :  { %1357 = vmatpush1.msra.mxu1 %v2487_v12  ;;  %1157 = vmatpush1.msra.mxu0 %v3981_v11  ;;  %v3986_v12 = vand.u32 4294901760, %v2567_v44  ;;  %v3992_v44 = vld [vmem:[#allocation43_spill] sm:$0xff] }
  0x84   :  { %824 = vmatprep.mubr.f32.mxu0 %v3982_v21  ;;  %1026 = vmatprep.mubr.f32.mxu1 %v3983_v7  ;;  %v4001_v4 = vand.u32 4294901760, %v3992_v44 }
  0x85   :  { %1358 = vmatprep.subr.mxu1 %v3898_v32  ;;  %827 = vmatmul.mubr.f32.gmra.mxu0 %v3984_v30 }
  0x86   :  { %1030 = vmatmul.mubr.f32.gmra.mxu1 %v3985_v51  ;;  %1158 = vmatprep.subr.mxu0 %v3898_v32 }
  0x87   :  { %1360 = vmatpush1.msra.mxu1 %v2502_v17  ;;  %1162 = vmatpush1.msra.mxu0 %v3986_v12  ;;  %v3991_v17 = vand.u32 4294901760, %v2578_v49  ;;  %v3997_v49 = vand.u32 4294901760, %v3987_v35 }
  0x88   :  { %1361 = vmatprep.subr.mxu1 %v3898_v32  ;;  %833 = vmatprep.mubr.f32.mxu0 %v3987_v35 }
  0x89   :  { %1037 = vmatprep.mubr.f32.mxu1 %v3988_v39  ;;  %1163 = vmatprep.subr.mxu0 %v3898_v32 }
  0x8a   :  { %1363 = vmatpush1.msra.mxu1 %v2521_v25  ;;  %836 = vmatmul.mubr.f32.gmra.mxu0 %v3989_v2  ;;  %v3994_v25 = vand.u32 4294901760, %v2594_v56  ;;  %v3999_v56 = vand.u32 4294901760, %v3989_v2 }
  0x8b   :  { %1041 = vmatmul.mubr.f32.gmra.mxu1 %v3990_v54  ;;  %1167 = vmatpush1.msra.mxu0 %v3991_v17 }
  0x8c   :  { %1364 = vmatprep.subr.mxu1 %v3898_v32  ;;  %1168 = vmatprep.subr.mxu0 %v3898_v32 }
  0x8d   :  { %1366 = vmatpush1.msra.mxu1 %v2525_v27  ;;  %842 = vmatprep.mubr.f32.mxu0 %v3992_v44  ;;  %v3996_v27 = vld [vmem:[#allocation45_spill] sm:$0xff] }
  0x8e   :  { %1048 = vmatprep.mubr.f32.mxu1 %v3993_v55  ;;  %1172 = vmatpush1.msra.mxu0 %v3994_v25 }
  0x8f   :  { %845 = vmatmul.mubr.f32.gmra.mxu0 %v3014_v33  ;;  %1052 = vmatmul.mubr.f32.gmra.mxu1 %v3995_v13  ;;  %v4008_v33 = vand.u32 4294901760, %v3060_v22 }
  0x90   :  { %1367 = vmatprep.subr.mxu1 %v3898_v32  ;;  %1173 = vmatprep.subr.mxu0 %v3898_v32 }
  0x91   :  { %1369 = vmatpush1.msra.mxu1 %v2559_v41  ;;  %851 = vmatprep.mubr.f32.mxu0 %v3996_v27  ;;  %v4000_v41 = vand.u32 4294901760, %v2605_v59  ;;  %v4004_v59 = vand.u32 4294901760, %v3996_v27 }
  0x92   :  { %1059 = vmatprep.mubr.f32.mxu1 %v3997_v49  ;;  %1177 = vmatpush1.msra.mxu0 %v3998_v15 }
  0x93   :  { %854 = vmatmul.mubr.f32.gmra.mxu0 %v3046_v47  ;;  %1063 = vmatmul.mubr.f32.gmra.mxu1 %v3999_v56 }
  0x94   :  { %1370 = vmatprep.subr.mxu1 %v3898_v32  ;;  %1178 = vmatprep.subr.mxu0 %v3898_v32 }
  0x95   :  { %1372 = vmatpush1.msra.mxu1 %v2562_v42  ;;  %1182 = vmatpush1.msra.mxu0 %v4000_v41  ;;  %v4003_v42 = vand.u32 4294901760, %v2636_v14  ;;  %v4007_v14 = vand.u32 4294901760, %v3949_v36  ;;  %v4014_v36 = vld [vmem:[#allocation7_spill] sm:$0xff] }
  0x96   :  { %860 = vmatprep.mubr.f32.mxu0 %v3060_v22  ;;  %1070 = vmatprep.mubr.f32.mxu1 %v4001_v4  ;;  %v4012_v22 = vand.u32 4294901760, %v3097_v61 }
  0x97   :  { %1373 = vmatprep.subr.mxu1 %v3898_v32  ;;  %863 = vmatmul.mubr.f32.gmra.mxu0 %v3075_v40 }
  0x98   :  { %1074 = vmatmul.mubr.f32.gmra.mxu1 %v4002_v58  ;;  %1183 = vmatprep.subr.mxu0 %v3898_v32 }
  0x99   :  { %1375 = vmatpush1.msra.mxu1 %v2564_v43  ;;  %1187 = vmatpush1.msra.mxu0 %v4003_v42  ;;  %v4006_v43 = vand.u32 4294901760, %v3046_v47  ;;  %v4010_v47 = vand.u32 4294901760, %v3075_v40  ;;  %v4015_v40 = vand.u32 4294901760, %v3108_v3 }
  0x9a   :  { %1188 = vmatprep.subr.mxu0 %v3898_v32  ;;  %1376 = vmatprep.subr.mxu1 %v3898_v32 }
  0x9b   :  { %869 = vmatprep.mubr.f32.mxu0 %v3097_v61  ;;  %1081 = vmatprep.mubr.f32.mxu1 %v4004_v59  ;;  %v4018_v61 = vld [vmem:[#allocation14_spill] sm:$0xff] }
  0x9c   :  { %1192 = vmatpush1.msra.mxu0 %v4005_v52  ;;  %1378 = vmatpush1.msra.mxu1 %v3948_v53  ;;  %v4009_v53 = vand.u32 4294901760, %v2725_v37  ;;  %v4013_v37 = vand.u32 4294901760, %v2774_v60  ;;  %v4019_v60 = vand.u32 4294901760, %v3132_v26 }
  0x9d   :  { %872 = vmatmul.mubr.f32.gmra.mxu0 %v3108_v3  ;;  %1085 = vmatmul.mubr.f32.gmra.mxu1 %v4006_v43  ;;  %v4020_v3 = vld [vmem:[#allocation16_spill] sm:$0xff] }
  0x9e   :  { %1193 = vmatprep.subr.mxu0 %v3898_v32  ;;  %1379 = vmatprep.subr.mxu1 %v3898_v32 }
  0x9f   :  { %1197 = vmatpush1.msra.mxu0 %v4007_v14  ;;  %1381 = vmatpush1.msra.mxu1 %v3950_v19  ;;  %v4011_v19 = vand.u32 4294901760, %v3951_v0  ;;  %v4017_v0 = vand.u32 4294901760, %v3125_v45 }
  0xa0   :  { %1198 = vmatprep.subr.mxu0 %v3898_v32  ;;  %878 = vmatprep.mubr.f32.mxu0 %v3125_v45  ;;  %v4022_v45 = vld [vmem:[#allocation22_spill] sm:$0xff] }
  0xa1   :  { %1092 = vmatprep.mubr.f32.mxu1 %v4008_v33  ;;  %1202 = vmatpush1.msra.mxu0 %v4009_v53 }
  0xa2   :  { %881 = vmatmul.mubr.f32.gmra.mxu0 %v3132_v26  ;;  %1096 = vmatmul.mubr.f32.gmra.mxu1 %v4010_v47  ;;  %v4023_v26 = vld [vmem:[#allocation25_spill] sm:$0xff] }
  0xa3   :  { %1231 = vmatprep.subr.mxu0 %v3898_v32  ;;  %1382 = vmatprep.subr.mxu1 %v3898_v32 }
  0xa4   :  { %1235 = vmatpush2.msra.mxu0 %v4011_v19  ;;  %1384 = vmatpush1.msra.mxu1 %v3952_v28  ;;  %v4021_v28 = vld [vmem:[#allocation21_spill] sm:$0xff] }
  0xa5   :  { %1236 = vmatprep.subr.mxu0 %v3898_v32  ;;  %1103 = vmatprep.mubr.f32.mxu1 %v4012_v22 }
  0xa6   :  { %1240 = vmatpush2.msra.mxu0 %v4013_v37  ;;  %1242 = vmatprep.mubr.f32.mxu0 %v4014_v36 }
  0xa7   :  { %1385 = vmatprep.subr.mxu1 %v3898_v32  ;;  %1107 = vmatmul.mubr.f32.gmra.mxu1 %v4015_v40 }
  0xa8   :  { %1244 = vmatmul.mubr.f32.vlgmr.msra.gmra.mxu0 %v4016_v1  ;;  %1387 = vmatpush1.msra.mxu1 %v3955_v24  ;;  %v4026_v24 = vld [vmem:[#allocation28_spill] sm:$0xff] }
  0xa9   :  { %1416 = vmatprep.subr.mxu1 %v3898_v32  ;;  %1114 = vmatprep.mubr.f32.mxu1 %v4017_v0 }
  0xaa   :  { %1249 = vmatprep.mubr.f32.mxu0 %v4018_v61  ;;  %1418 = vmatpush2.msra.mxu1 %v3957_v34  ;;  %v4024_v34 = vld [vmem:[#allocation26_spill] sm:$0xff] }
  0xab   :  { %1118 = vmatmul.mubr.f32.gmra.mxu1 %v4019_v60  ;;  %1419 = vmatprep.subr.mxu1 %v3898_v32 }
  0xac   :  { %1251 = vmatmul.mubr.f32.gmra.mxu0 %v4020_v3  ;;  %1421 = vmatpush2.msra.mxu1 %v3959_v63  ;;  %v4025_v63 = vld [vmem:[#allocation27_spill] sm:$0xff] }
  0xad   :  { %1256 = vmatprep.mubr.f32.mxu0 %v4021_v28  ;;  %1423 = vmatprep.mubr.f32.mxu1 %v4014_v36 }
  0xae   :  { %2322 = vmatprep.subr.mxu0 %v3898_v32  ;;  %2333 = vmatprep.subr.mxu1 %v3898_v32 }
  0xaf   :  { %1425 = vmatmul.mubr.f32.vlgmr.msra.gmra.mxu1 %v4016_v1 }
  0xb0   :  { %1258 = vmatmul.mubr.f32.gmra.mxu0 %v4022_v45  ;;  %1430 = vmatprep.mubr.f32.mxu1 %v4018_v61 }
  0xb1   :  { %1263 = vmatprep.mubr.f32.mxu0 %v4023_v26 }
  0xb3   :  { %1432 = vmatmul.mubr.f32.gmra.mxu1 %v4020_v3 }
  0xb4   :  { %1265 = vmatmul.mubr.f32.gmra.mxu0 %v4024_v34  ;;  %1437 = vmatprep.mubr.f32.mxu1 %v4021_v28 }
  0xb5   :  { %1270 = vmatprep.mubr.f32.mxu0 %v4025_v63 }
  0xb7   :  { %1439 = vmatmul.mubr.f32.gmra.mxu1 %v4022_v45 }
  0xb8   :  { %1272 = vmatmul.mubr.f32.gmra.mxu0 %v4026_v24  ;;  %1444 = vmatprep.mubr.f32.mxu1 %v4023_v26 }
  0xb9   :  { %1277 = vmatprep.mubr.f32.mxu0 %v4027_v16 }
  0xbb   :  { %1446 = vmatmul.mubr.f32.gmra.mxu1 %v4024_v34 }
  0xbc   :  { %1279 = vmatmul.mubr.f32.gmra.mxu0 %v4028_v5  ;;  %1451 = vmatprep.mubr.f32.mxu1 %v4025_v63 }
  0xbd   :  { %1284 = vmatprep.mubr.f32.mxu0 %v4029_v18 }
  0xbf   :  { %1453 = vmatmul.mubr.f32.gmra.mxu1 %v4026_v24 }
  0xc0   :  { %1286 = vmatmul.mubr.f32.gmra.mxu0 %v4030_v50  ;;  %1458 = vmatprep.mubr.f32.mxu1 %v4027_v16 }
  0xc1   :  { %1291 = vmatprep.mubr.f32.mxu0 %v4031_v38 }
  0xc3   :  { %1460 = vmatmul.mubr.f32.gmra.mxu1 %v4028_v5 }
  0xc4   :  { %1293 = vmatmul.mubr.f32.gmra.mxu0 %v2919_v31  ;;  %1465 = vmatprep.mubr.f32.mxu1 %v4029_v18 }
  0xc5   :  { %1298 = vmatprep.mubr.f32.mxu0 %v2943_v9 }
  0xc7   :  { %1467 = vmatmul.mubr.f32.gmra.mxu1 %v4030_v50 }
  0xc8   :  { %1300 = vmatmul.mubr.f32.gmra.mxu0 %v2952_v48  ;;  %1472 = vmatprep.mubr.f32.mxu1 %v4031_v38 }
  0xc9   :  { %1305 = vmatprep.mubr.f32.mxu0 %v2977_v8 }
  0xcb   :  { %1474 = vmatmul.mubr.f32.gmra.mxu1 %v2919_v31  ;;  %v4036_v31 = vld [vmem:[#allocation48_spill] sm:$0xff] }
  0xcc   :  { %1307 = vmatmul.mubr.f32.gmra.mxu0 %v4032_v23  ;;  %1479 = vmatprep.mubr.f32.mxu1 %v2943_v9  ;;  %v4037_v9 = vld [vmem:[#allocation49_spill] sm:$0xff] }
  0xcd   :  { %1312 = vmatprep.mubr.f32.mxu0 %v3007_v29 }
  0xcf   :  { %1481 = vmatmul.mubr.f32.gmra.mxu1 %v2952_v48  ;;  %v4038_v48 = vld [vmem:[#allocation50_spill] sm:$0xff] }
  0xd0   :  { %1314 = vmatmul.mubr.f32.gmra.mxu0 %v4033_v6  ;;  %1486 = vmatprep.mubr.f32.mxu1 %v2977_v8  ;;  %v4039_v8 = vld [vmem:[#allocation51_spill] sm:$0xff] }
  0xd1   :  { %1319 = vmatprep.mubr.f32.mxu0 %v4034_v20 }
  0xd3   :  { %1488 = vmatmul.mubr.f32.gmra.mxu1 %v4032_v23 }
  0xd4   :  { %1321 = vmatmul.mubr.f32.gmra.mxu0 %v4035_v62  ;;  %1493 = vmatprep.mubr.f32.mxu1 %v3007_v29 }
  0xd5   :  { %1326 = vmatprep.mubr.f32.mxu0 %v4036_v31 }
  0xd7   :  { %1495 = vmatmul.mubr.f32.gmra.mxu1 %v4033_v6 }
  0xd8   :  { %1328 = vmatmul.mubr.f32.gmra.mxu0 %v4037_v9  ;;  %1500 = vmatprep.mubr.f32.mxu1 %v4034_v20 }
  0xd9   :  { %1333 = vmatprep.mubr.f32.mxu0 %v4038_v48 }
  0xdb   :  { %1502 = vmatmul.mubr.f32.gmra.mxu1 %v4035_v62 }
  0xdc   :  { %1335 = vmatmul.mubr.f32.gmra.mxu0 %v4039_v8  ;;  %1507 = vmatprep.mubr.f32.mxu1 %v4036_v31 }
  0xdd   :  { %2330 = vmatprep.mubr.msk.f32.mxu0 %vm2420_vm1, %v3898_v32 }
  0xdf   :  { %1509 = vmatmul.mubr.f32.gmra.mxu1 %v4037_v9 }
  0xe0   :  { %1514 = vmatprep.mubr.f32.mxu1 %v4038_v48 }
  0xe3   :  { %1516 = vmatmul.mubr.f32.gmra.mxu1 %v4039_v8 }
  0xe4   :  { %2341 = vmatprep.mubr.msk.f32.mxu1 %vm2420_vm1, %v3898_v32 }
  0xe7   :  { %v207_v29 = vpop.f32.mrf.mxu0 }
  0xe9   :  { %v209_v10 = vpop.f32.mrf.mxu0 }
  0xeb   :  { %v222_v46 = vpop.f32.mrf.mxu0 }
  0xed   :  { %v224_v57 = vpop.f32.mrf.mxu0 }
  0xef   :  { %v237_v11 = vpop.f32.mrf.mxu0 }
  0xf0   :  { %v564_v21 = vpop.f32.mrf.mxu1 }
  0xf1   :  { %v565_v7 = vadd.f32 %v564_v21, %v207_v29  ;;  %v239_v30 = vpop.f32.mrf.mxu0 }
  0xf2   :  { %v566_v51 = vpop.f32.mrf.mxu1 }
  0xf3   :  { %v252_v12 = vpop.f32.mrf.mxu0 }
  0xf4   :  { %v571_v35 = vpop.f32.mrf.mxu1 }
  0xf5   :  { %v572_v39 = vadd.f32 %v571_v35, %v222_v46  ;;  %v254_v2 = vpop.f32.mrf.mxu0 }
  0xf6   :  { %v573_v54 = vpop.f32.mrf.mxu1 }
  0xf7   :  { %v267_v17 = vpop.f32.mrf.mxu0 }
  0xf8   :  { %v578_v44 = vpop.f32.mrf.mxu1 }
  0xf9   :  { %v3421_v55 = vadd.f32 %v578_v44, %v237_v11  ;;  %v269_v25 = vpop.f32.mrf.mxu0 }
  0xfa   :  { %v580_v13 = vpop.f32.mrf.mxu1 }
  0xfc   :  { %v282_v27 = vpop.f32.mrf.mxu0 }
  0xfd   :  { %v585_v49 = vpop.f32.mrf.mxu1 }
  0xfe   :  { %v3423_v15 = vadd.f32 %v585_v49, %v252_v12  ;;  %v284_v56 = vpop.f32.mrf.mxu0 }
  0xff   :  { %v587_v41 = vpop.f32.mrf.mxu1 }
 0x101   :  { %v297_v4 = vpop.f32.mrf.mxu0  ;;  %v592_v58 = vpop.f32.mrf.mxu1 }
 0x102   :  { %v3425_v42 = vadd.f32 %v592_v58, %v267_v17 }
 0x103   :  { %v299_v59 = vpop.f32.mrf.mxu0  ;;  %v594_v52 = vpop.f32.mrf.mxu1 }
 0x105   :  { %v312_v43 = vpop.f32.mrf.mxu0 }
 0x106   :  { %v599_v14 = vpop.f32.mrf.mxu1 }
 0x107   :  { %v3427_v33 = vadd.f32 %v599_v14, %v282_v27  ;;  %v314_v53 = vpop.f32.mrf.mxu0 }
 0x108   :  { %v601_v47 = vpop.f32.mrf.mxu1 }
 0x10a   :  { %v327_v19 = vpop.f32.mrf.mxu0 }
 0x10b   :  { %v606_v22 = vpop.f32.mrf.mxu1 }
 0x10c   :  { %v3429_v37 = vadd.f32 %v606_v22, %v297_v4  ;;  %v329_v36 = vpop.f32.mrf.mxu0 }
 0x10d   :  { %v608_v40 = vpop.f32.mrf.mxu1 }
 0x10f   :  { %v342_v1 = vpop.f32.mrf.mxu0  ;;  %v613_v0 = vpop.f32.mrf.mxu1 }
 0x110   :  { %v3431_v61 = vadd.f32 %v613_v0, %v312_v43 }
 0x111   :  { %v344_v60 = vpop.f32.mrf.mxu0  ;;  %v615_v3 = vpop.f32.mrf.mxu1 }
 0x113   :  { %v357_v28 = vpop.f32.mrf.mxu0  ;;  %v620_v45 = vpop.f32.mrf.mxu1 }
 0x114   :  { %v3433_v26 = vadd.f32 %v620_v45, %v327_v19 }
 0x115   :  { %v359_v34 = vpop.f32.mrf.mxu0  ;;  %v622_v63 = vpop.f32.mrf.mxu1 }
 0x117   :  { %v372_v24 = vpop.f32.mrf.mxu0 }
 0x118   :  { %v627_v16 = vpop.f32.mrf.mxu1 }
 0x119   :  { %v3435_v5 = vadd.f32 %v627_v16, %v342_v1  ;;  %v374_v18 = vpop.f32.mrf.mxu0 }
 0x11a   :  { %v629_v50 = vpop.f32.mrf.mxu1 }
 0x11d   :  { %v387_v38 = vpop.f32.mrf.mxu0  ;;  %v634_v23 = vpop.f32.mrf.mxu1 }
 0x11e   :  { %v3437_v6 = vadd.f32 %v634_v23, %v357_v28 }
 0x11f   :  { %v389_v20 = vpop.f32.mrf.mxu0  ;;  %v636_v62 = vpop.f32.mrf.mxu1 }
 0x122   :  { %v402_v31 = vpop.f32.mrf.mxu0  ;;  %v641_v9 = vpop.f32.mrf.mxu1 }
 0x123   :  { %v3439_v48 = vadd.f32 %v641_v9, %v372_v24 }
 0x124   :  { %v404_v8 = vpop.f32.mrf.mxu0  ;;  %v643_v29 = vpop.f32.mrf.mxu1 }
 0x127   :  { %v648_v10 = vpop.f32.mrf.mxu1 }
 0x128   :  { %v3441_v46 = vadd.f32 %v648_v10, %v387_v38  ;;  %v765_v57 = vpop.f32.mrf.mxu0 }
 0x129   :  { %v766_v11 = vadd.f32 %v765_v57, %v565_v7  ;;  %v650_v21 = vpop.f32.mrf.mxu1 }
 0x12a   :  { %v767_v30 = vpop.f32.mrf.mxu0 }
 0x12b   :  { %v655_v51 = vpop.f32.mrf.mxu1 }
 0x12c   :  { %v3443_v12 = vadd.f32 %v655_v51, %v402_v31  ;;  %v774_v35 = vpop.f32.mrf.mxu0 }
 0x12d   :  { %v775_v2 = vadd.f32 %v774_v35, %v572_v39  ;;  %v657_v54 = vpop.f32.mrf.mxu1 }
 0x12e   :  { %v776_v17 = vpop.f32.mrf.mxu0 }
 0x12f   :  { %v976_v44 = vpop.f32.mrf.mxu1 }
 0x130   :  { %v783_v25 = vpop.f32.mrf.mxu0  ;;  %v3445_v13 = vadd.f32 %v976_v44, %v766_v11 }
 0x131   :  { %v784_v27 = vadd.f32 %v783_v25, %v3421_v55  ;;  %v978_v49 = vpop.f32.mrf.mxu1 }
 0x132   :  { %v785_v56 = vpop.f32.mrf.mxu0 }
 0x133   :  { %v987_v41 = vpop.f32.mrf.mxu1 }
 0x134   :  { %v792_v4 = vpop.f32.mrf.mxu0  ;;  %v3448_v7 = vadd.f32 %v987_v41, %v775_v2 }
 0x135   :  { %v793_v58 = vadd.f32 %v792_v4, %v3423_v15  ;;  %v989_v59 = vpop.f32.mrf.mxu1 }
 0x136   :  { %v794_v52 = vpop.f32.mrf.mxu0 }
 0x137   :  { %v998_v43 = vpop.f32.mrf.mxu1 }
 0x138   :  { %v801_v39 = vpop.f32.mrf.mxu0  ;;  %v3451_v14 = vadd.f32 %v998_v43, %v784_v27 }
 0x139   :  { %v802_v53 = vadd.f32 %v801_v39, %v3425_v42  ;;  %v1000_v47 = vpop.f32.mrf.mxu1  ;;  %v1763_v39 = vld [vmem:[%s3754_s4 + $0x18] sm:$0xff] }
 0x13a   :  { %v803_v19 = vpop.f32.mrf.mxu0 }
 0x13c   :  { %v810_v22 = vpop.f32.mrf.mxu0 }
 0x13d   :  { %v811_v55 = vadd.f32 %v810_v22, %v3427_v33  ;;  %v1009_v36 = vpop.f32.mrf.mxu1 }
 0x13e   :  { %v3455_v40 = vadd.f32 %v1009_v36, %v793_v58  ;;  %v812_v1 = vpop.f32.mrf.mxu0 }
 0x13f   :  { %v1011_v0 = vpop.f32.mrf.mxu1 }
 0x141   :  { %v819_v60 = vpop.f32.mrf.mxu0  ;;  %v1020_v15 = vpop.f32.mrf.mxu1 }
 0x142   :  { %v820_v3 = vadd.f32 %v819_v60, %v3429_v37  ;;  %v3458_v28 = vadd.f32 %v1020_v15, %v802_v53  ;;  %v3488_v53 = vand.u32 4294901760, %v1763_v39  ;;  %v1760_v15 = vld [vmem:[%s3754_s4] sm:$0xff] }
 0x143   :  { %v821_v45 = vpop.f32.mrf.mxu0  ;;  %v1022_v34 = vpop.f32.mrf.mxu1 }
 0x144   :  { %2323 = vmatpush3.msra.mxu0 %v3488_v53  ;;  %v3516_v45 = vand.u32 4294901760, %v1760_v15 }
 0x145   :  { %v828_v63 = vpop.f32.mrf.mxu0  ;;  %2324 = vmatprep.subr.mxu0 %v3898_v32 }
 0x146   :  { %v829_v42 = vadd.f32 %v828_v63, %v3431_v61  ;;  %v1031_v24 = vpop.f32.mrf.mxu1 }
 0x147   :  { %v3461_v16 = vadd.f32 %v1031_v24, %v811_v55  ;;  %v830_v33 = vpop.f32.mrf.mxu0  ;;  %v1761_v55 = vld [vmem:[%s3754_s4 + $0x8] sm:$0xff] }
 0x148   :  { %v1033_v18 = vpop.f32.mrf.mxu1  ;;  %v3510_v60 = vand.u32 4294901760, %v1761_v55 }
 0x149   :  { %v3532_v18 = vsub.f32 %v1760_v15, %v3516_v45 }
 0x14a   :  { %v837_v50 = vpop.f32.mrf.mxu0  ;;  %v3526_v24 = vsub.f32 %v1761_v55, %v3510_v60 }
 0x14b   :  { %v838_v38 = vadd.f32 %v837_v50, %v3433_v26  ;;  %v1042_v23 = vpop.f32.mrf.mxu1 }
 0x14c   :  { %v3464_v20 = vadd.f32 %v1042_v23, %v820_v3  ;;  %v839_v62 = vpop.f32.mrf.mxu0 }
 0x14d   :  { %v1044_v37 = vpop.f32.mrf.mxu1  ;;  %v1897_v62 = vand.u32 4294901760, %v3526_v24 }
 0x14f   :  { %v846_v31 = vpop.f32.mrf.mxu0  ;;  %v1053_v9 = vpop.f32.mrf.mxu1 }
 0x150   :  { %v847_v8 = vadd.f32 %v846_v31, %v3435_v5  ;;  %v3467_v29 = vadd.f32 %v1053_v9, %v829_v42  ;;  %v1904_v9 = vand.u32 4294901760, %v3532_v18 }
 0x151   :  { %v848_v61 = vpop.f32.mrf.mxu0  ;;  %v1055_v10 = vpop.f32.mrf.mxu1 }
 0x152   :  { %v1898_v10 = vsub.f32 %v3526_v24, %v1897_v62 }
 0x153   :  { %v855_v57 = vpop.f32.mrf.mxu0  ;;  %v1064_v11 = vpop.f32.mrf.mxu1 }
 0x154   :  { %v856_v21 = vadd.f32 %v855_v57, %v3437_v6  ;;  %v3470_v30 = vadd.f32 %v1064_v11, %v838_v38 }
 0x155   :  { %v857_v26 = vpop.f32.mrf.mxu0  ;;  %v1066_v51 = vpop.f32.mrf.mxu1 }
 0x156   :  { %v1899_v26 = vand.u32 4294901760, %v1898_v10 }
 0x157   :  { %v864_v35 = vpop.f32.mrf.mxu0 }
 0x158   :  { %v865_v2 = vadd.f32 %v864_v35, %v3439_v48  ;;  %v1075_v54 = vpop.f32.mrf.mxu1 }
 0x159   :  { %v3473_v17 = vadd.f32 %v1075_v54, %v847_v8  ;;  %v866_v44 = vpop.f32.mrf.mxu0 }
 0x15a   :  { %v1077_v5 = vpop.f32.mrf.mxu1 }
 0x15d   :  { %v873_v25 = vpop.f32.mrf.mxu0  ;;  %v1086_v27 = vpop.f32.mrf.mxu1 }
 0x15e   :  { %v3476_v49 = vadd.f32 %v873_v25, %v3441_v46  ;;  %v3478_v56 = vadd.f32 %v1086_v27, %v856_v21  ;;  %v1762_v46 = vld [vmem:[%s3754_s4 + $0x10] sm:$0xff] }
 0x15f   :  { %v875_v6 = vpop.f32.mrf.mxu0  ;;  %v1088_v41 = vpop.f32.mrf.mxu1  ;;  %v3499_v19 = vand.u32 4294901760, %v1762_v46 }
 0x161   :  { %2325 = vmatpush3.msra.mxu0 %v3499_v19  ;;  %v3508_v0 = vsub.f32 %v1762_v46, %v3499_v19 }
 0x162   :  { %v882_v4 = vpop.f32.mrf.mxu0  ;;  %v1097_v58 = vpop.f32.mrf.mxu1  ;;  %2326 = vmatprep.subr.mxu0 %v3898_v32 }
 0x163   :  { %v3481_v59 = vadd.f32 %v882_v4, %v3443_v12  ;;  %v3483_v48 = vadd.f32 %v1097_v58, %v865_v2  ;;  %v3497_v12 = vsub.f32 %v1763_v39, %v3488_v53  ;;  %v1890_v42 = vand.u32 4294901760, %v3508_v0  ;;  %2327 = vmatpush3.msra.mxu0 %v3510_v60 }
 0x164   :  { %v884_v52 = vpop.f32.mrf.mxu0  ;;  %v1099_v43 = vpop.f32.mrf.mxu1  ;;  %2328 = vmatprep.subr.mxu0 %v3898_v32 }
 0x165   :  { %v1883_v1 = vand.u32 4294901760, %v3497_v12  ;;  %v1891_v23 = vsub.f32 %v3508_v0, %v1890_v42  ;;  %2329 = vmatpush3.msra.mxu0 %v3516_v45 }
 0x166   :  { %2344 = vmatprep.subr.mxu0 %v3898_v32 }
 0x167   :  { %v3493_v47 = vpop.f32.mrf.mxu1  ;;  %v1884_v63 = vsub.f32 %v3497_v12, %v1883_v1  ;;  %v1892_v61 = vand.u32 4294901760, %v1891_v23 }
 0x168   :  { %v1245_v22 = vpop.f32.mrf.mxu0 }
 0x169   :  { %v1110_v36 = vpop.f32.mrf.mxu1  ;;  %v1885_v38 = vand.u32 4294901760, %v1884_v63  ;;  %v1246_v37 = vadd.f32 %v1245_v22, %v3445_v13  ;;  %v1905_v13 = vsub.f32 %v3532_v18, %v1904_v9 }
 0x16a   :  { %v1247_v3 = vpop.f32.mrf.mxu0 }
 0x16b   :  { %v3518_v34 = vpop.f32.mrf.mxu1  ;;  %2334 = vmatpush3.msra.mxu1 %v1885_v38  ;;  %v1906_v2 = vand.u32 4294901760, %v1905_v13 }
 0x16c   :  { %v1252_v33 = vpop.f32.mrf.mxu0  ;;  %2335 = vmatprep.subr.mxu1 %v3898_v32 }
 0x16d   :  { %v1121_v50 = vpop.f32.mrf.mxu1  ;;  %2336 = vmatpush3.msra.mxu1 %v1892_v61  ;;  %v1253_v51 = vadd.f32 %v1252_v33, %v3448_v7 }
 0x16e   :  { %v1254_v31 = vpop.f32.mrf.mxu0  ;;  %2337 = vmatprep.subr.mxu1 %v3898_v32 }
 0x16f   :  { %v1426_v8 = vpop.f32.mrf.mxu1  ;;  %2338 = vmatpush3.msra.mxu1 %v1899_v26 }
 0x170   :  { %v1259_v57 = vpop.f32.mrf.mxu0  ;;  %v3547_v11 = vadd.f32 %v1426_v8, %v1246_v37  ;;  %2339 = vmatprep.subr.mxu1 %v3898_v32 }
 0x171   :  { %v1428_v21 = vpop.f32.mrf.mxu1  ;;  %2340 = vmatpush3.msra.mxu1 %v1906_v2  ;;  %v1260_v6 = vadd.f32 %v1259_v57, %v3451_v14 }
 0x172   :  { %v1261_v35 = vpop.f32.mrf.mxu0  ;;  %v1557_v44 = vmul.f32 %v3547_v11, %v3547_v11  ;;  %v1522_v7 = vsel %vm1521_vm2, %v3547_v11, 0.0  ;;  %2355 = vmatprep.subr.mxu1 %v3898_v32 }
 0x173   :  { %v1433_v54 = vpop.f32.mrf.mxu1 }
 0x174   :  { %v1266_v5 = vpop.f32.mrf.mxu0  ;;  %v3557_v25 = vadd.f32 %v1433_v54, %v1253_v51  ;;  %v1571_v39 = vsel %vm1521_vm2, %v1557_v44, 0.0 }
 0x175   :  { %v1435_v27 = vpop.f32.mrf.mxu1  ;;  %v1267_v15 = vadd.f32 %v1266_v5, %v3455_v40 }
 0x176   :  { %v1523_v41 = vsel %vm1521_vm2, %v3557_v25, 0.0  ;;  %v1558_v4 = vmul.f32 %v3557_v25, %v3557_v25  ;;  %v1268_v58 = vpop.f32.mrf.mxu0 }
 0x177   :  { %v1524_v52 = vadd.f32 %v1523_v41, %v1522_v7  ;;  %v1440_v43 = vpop.f32.mrf.mxu1 }
 0x178   :  { %v1572_v46 = vsel %vm1521_vm2, %v1558_v4, 0.0  ;;  %v1273_v22 = vpop.f32.mrf.mxu0  ;;  %v3570_v14 = vadd.f32 %v1440_v43, %v1260_v6 }
 0x179   :  { %v1573_v55 = vadd.f32 %v1572_v46, %v1571_v39  ;;  %v1442_v36 = vpop.f32.mrf.mxu1  ;;  %v1274_v10 = vadd.f32 %v1273_v22, %v3458_v28 }
 0x17a   :  { %v1525_v3 = vsel %vm1521_vm2, %v3570_v14, 0.0  ;;  %v1559_v63 = vmul.f32 %v3570_v14, %v3570_v14  ;;  %v1275_v33 = vpop.f32.mrf.mxu0 }
 0x17b   :  { %v1526_v50 = vadd.f32 %v1525_v3, %v1524_v52  ;;  %v1447_v38 = vpop.f32.mrf.mxu1 }
 0x17c   :  { %v1574_v23 = vsel %vm1521_vm2, %v1559_v63, 0.0  ;;  %v1280_v37 = vpop.f32.mrf.mxu0  ;;  %v3578_v31 = vadd.f32 %v1447_v38, %v1267_v15 }
 0x17d   :  { %v1575_v8 = vadd.f32 %v1574_v23, %v1573_v55  ;;  %v1449_v61 = vpop.f32.mrf.mxu1  ;;  %v1281_v5 = vadd.f32 %v1280_v37, %v3461_v16 }
 0x17e   :  { %v1527_v40 = vsel %vm1521_vm2, %v3578_v31, 0.0  ;;  %v1560_v57 = vmul.f32 %v3578_v31, %v3578_v31  ;;  %v1282_v13 = vpop.f32.mrf.mxu0 }
 0x17f   :  { %v1528_v21 = vadd.f32 %v1527_v40, %v1526_v50  ;;  %v1454_v26 = vpop.f32.mrf.mxu1 }
 0x180   :  { %v1576_v51 = vsel %vm1521_vm2, %v1560_v57, 0.0  ;;  %v1287_v35 = vpop.f32.mrf.mxu0  ;;  %v3586_v2 = vadd.f32 %v1454_v26, %v1274_v10 }
 0x181   :  { %v1577_v54 = vadd.f32 %v1576_v51, %v1575_v8  ;;  %v1456_v44 = vpop.f32.mrf.mxu1  ;;  %v1288_v46 = vadd.f32 %v1287_v35, %v3464_v20 }
 0x182   :  { %v1529_v28 = vsel %vm1521_vm2, %v3586_v2, 0.0  ;;  %v1561_v27 = vmul.f32 %v3586_v2, %v3586_v2  ;;  %v1289_v6 = vpop.f32.mrf.mxu0 }
 0x183   :  { %v1530_v7 = vadd.f32 %v1529_v28, %v1528_v21  ;;  %v1461_v41 = vpop.f32.mrf.mxu1 }
 0x184   :  { %v1578_v4 = vsel %vm1521_vm2, %v1561_v27, 0.0  ;;  %v1294_v58 = vpop.f32.mrf.mxu0  ;;  %v3594_v52 = vadd.f32 %v1461_v41, %v1281_v5 }
 0x185   :  { %v1579_v43 = vadd.f32 %v1578_v4, %v1577_v54  ;;  %v1463_v39 = vpop.f32.mrf.mxu1  ;;  %v1295_v23 = vadd.f32 %v1294_v58, %v3467_v29 }
 0x186   :  { %v1531_v16 = vsel %vm1521_vm2, %v3594_v52, 0.0  ;;  %v1562_v22 = vmul.f32 %v3594_v52, %v3594_v52  ;;  %v1296_v55 = vpop.f32.mrf.mxu0 }
 0x187   :  { %v1532_v36 = vadd.f32 %v1531_v16, %v1530_v7  ;;  %v1468_v15 = vpop.f32.mrf.mxu1 }
 0x188   :  { %v1580_v3 = vsel %vm1521_vm2, %v1562_v22, 0.0  ;;  %v1301_v63 = vpop.f32.mrf.mxu0  ;;  %v3602_v33 = vadd.f32 %v1468_v15, %v1288_v46 }
 0x189   :  { %v1581_v50 = vadd.f32 %v1580_v3, %v1579_v43  ;;  %v1470_v38 = vpop.f32.mrf.mxu1  ;;  %v1302_v51 = vadd.f32 %v1301_v63, %v3470_v30 }
 0x18a   :  { %v1533_v20 = vsel %vm1521_vm2, %v3602_v33, 0.0  ;;  %v1563_v37 = vmul.f32 %v3602_v33, %v3602_v33  ;;  %v1303_v8 = vpop.f32.mrf.mxu0 }
 0x18b   :  { %v1534_v61 = vadd.f32 %v1533_v20, %v1532_v36  ;;  %v1475_v10 = vpop.f32.mrf.mxu1 }
 0x18c   :  { %v1582_v40 = vsel %vm1521_vm2, %v1563_v37, 0.0  ;;  %v1308_v57 = vpop.f32.mrf.mxu0  ;;  %v3610_v13 = vadd.f32 %v1475_v10, %v1295_v23 }
 0x18d   :  { %v1583_v21 = vadd.f32 %v1582_v40, %v1581_v50  ;;  %v1477_v26 = vpop.f32.mrf.mxu1  ;;  %v1309_v4 = vadd.f32 %v1308_v57, %v3473_v17 }
 0x18e   :  { %v1535_v29 = vsel %vm1521_vm2, %v3610_v13, 0.0  ;;  %v1564_v35 = vmul.f32 %v3610_v13, %v3610_v13  ;;  %v1310_v54 = vpop.f32.mrf.mxu0 }
 0x18f   :  { %v1536_v44 = vadd.f32 %v1535_v29, %v1534_v61  ;;  %v1482_v5 = vpop.f32.mrf.mxu1  ;;  %v1109_v29 = vadd.f32 %v3493_v47, %v3476_v49  ;;  %v1120_v49 = vadd.f32 %v3518_v34, %v3481_v59 }
 0x190   :  { %v1584_v28 = vsel %vm1521_vm2, %v1564_v35, 0.0  ;;  %v1315_v27 = vpop.f32.mrf.mxu0  ;;  %v3618_v6 = vadd.f32 %v1482_v5, %v1302_v51 }
 0x191   :  { %v1585_v7 = vadd.f32 %v1584_v28, %v1583_v21  ;;  %v1484_v41 = vpop.f32.mrf.mxu1  ;;  %v1316_v3 = vadd.f32 %v1315_v27, %v3478_v56 }
 0x192   :  { %v1537_v30 = vsel %vm1521_vm2, %v3618_v6, 0.0  ;;  %v1565_v58 = vmul.f32 %v3618_v6, %v3618_v6  ;;  %v1317_v43 = vpop.f32.mrf.mxu0 }
 0x193   :  { %v1538_v39 = vadd.f32 %v1537_v30, %v1536_v44  ;;  %v1489_v46 = vpop.f32.mrf.mxu1 }
 0x194   :  { %v1586_v16 = vsel %vm1521_vm2, %v1565_v58, 0.0  ;;  %v1322_v22 = vpop.f32.mrf.mxu0  ;;  %v3626_v55 = vadd.f32 %v1489_v46, %v1309_v4 }
 0x195   :  { %v1587_v36 = vadd.f32 %v1586_v16, %v1585_v7  ;;  %v1491_v15 = vpop.f32.mrf.mxu1  ;;  %v1323_v40 = vadd.f32 %v1322_v22, %v3483_v48 }
 0x196   :  { %v1539_v17 = vsel %vm1521_vm2, %v3626_v55, 0.0  ;;  %v1566_v63 = vmul.f32 %v3626_v55, %v3626_v55  ;;  %v1324_v50 = vpop.f32.mrf.mxu0 }
 0x197   :  { %v1540_v38 = vadd.f32 %v1539_v17, %v1538_v39  ;;  %v1496_v23 = vpop.f32.mrf.mxu1 }
 0x198   :  { %v1588_v20 = vsel %vm1521_vm2, %v1566_v63, 0.0  ;;  %v1329_v37 = vpop.f32.mrf.mxu0  ;;  %v3634_v8 = vadd.f32 %v1496_v23, %v1316_v3 }
 0x199   :  { %v1589_v61 = vadd.f32 %v1588_v20, %v1587_v36  ;;  %v1498_v10 = vpop.f32.mrf.mxu1  ;;  %v1330_v48 = vadd.f32 %v1329_v37, %v1109_v29 }
 0x19a   :  { %v1541_v56 = vsel %vm1521_vm2, %v3634_v8, 0.0  ;;  %v1567_v57 = vmul.f32 %v3634_v8, %v3634_v8  ;;  %v1331_v21 = vpop.f32.mrf.mxu0 }
 0x19b   :  { %v1542_v26 = vadd.f32 %v1541_v56, %v1540_v38  ;;  %v1503_v51 = vpop.f32.mrf.mxu1 }
 0x19c   :  { %v1590_v35 = vsel %vm1521_vm2, %v1567_v57, 0.0  ;;  %v1336_v54 = vpop.f32.mrf.mxu0  ;;  %v3644_v44 = vadd.f32 %v1503_v51, %v1323_v40 }
 0x19d   :  { %v1591_v5 = vadd.f32 %v1590_v35, %v1589_v61  ;;  %v1505_v28 = vpop.f32.mrf.mxu1  ;;  %v1337_v46 = vadd.f32 %v1336_v54, %v1120_v49 }
 0x19e   :  { %v1543_v27 = vsel %vm1521_vm2, %v3644_v44, 0.0  ;;  %v1568_v7 = vmul.f32 %v3644_v44, %v3644_v44  ;;  %v1338_v41 = vpop.f32.mrf.mxu0 }
 0x19f   :  { %v1544_v4 = vadd.f32 %v1543_v27, %v1542_v26  ;;  %v1510_v30 = vpop.f32.mrf.mxu1 }
 0x1a0   :  { %v1592_v47 = vsel %vm1521_vm2, %v1568_v7, 0.0  ;;  %v3653_v58 = vadd.f32 %v1510_v30, %v1330_v48 }
 0x1a1   :  { %v1593_v43 = vadd.f32 %v1592_v47, %v1591_v5  ;;  %v1512_v39 = vpop.f32.mrf.mxu1 }
 0x1a2   :  { %v1545_v16 = vsel %vm1521_vm2, %v3653_v58, 0.0  ;;  %v1569_v22 = vmul.f32 %v3653_v58, %v3653_v58 }
 0x1a3   :  { %v1546_v36 = vadd.f32 %v1545_v16, %v1544_v4  ;;  %v1517_v15 = vpop.f32.mrf.mxu1 }
 0x1a4   :  { %v1594_v3 = vsel %vm1521_vm2, %v1569_v22, 0.0  ;;  %v1518_v17 = vadd.f32 %v1517_v15, %v1337_v46 }
 0x1a5   :  { %v1595_v63 = vadd.f32 %v1594_v3, %v1593_v43  ;;  %v1519_v59 = vpop.f32.mrf.mxu1 }
 0x1a6   :  { %v1547_v34 = vsel %vm1521_vm2, %v1518_v17, 0.0  ;;  %v1570_v50 = vmul.f32 %v1518_v17, %v1518_v17 }
 0x1a7   :  { %v1548_v38 = vadd.f32 %v1547_v34, %v1546_v36 }
 0x1a8   :  { %v1596_v23 = vsel %vm1521_vm2, %v1570_v50, 0.0 }
 0x1a9   :  { %v1549_v20 = vrot.slane %v1548_v38, 4  ;;  %v1597_v37 = vadd.f32 %v1596_v23, %v1595_v63 }
 0x1ab   :  { %v1550_v61 = vadd.f32 %v1549_v20, %v1548_v38  ;;  %v1598_v10 = vrot.slane %v1597_v37, 4 }
 0x1ad   :  { %v1551_v40 = vrot.slane %v1550_v61, 2  ;;  %v1599_v56 = vadd.f32 %v1598_v10, %v1597_v37 }
 0x1af   :  { %v1552_v57 = vadd.f32 %v1551_v40, %v1550_v61  ;;  %v1600_v21 = vrot.slane %v1599_v56, 2 }
 0x1b1   :  { %v1553_v26 = vrot.slane %v1552_v57, 1  ;;  %v1601_v51 = vadd.f32 %v1600_v21, %v1599_v56 }
 0x1b3   :  { %v1554_v29 = vadd.f32 %v1553_v26, %v1552_v57  ;;  %v1602_v35 = vrot.slane %v1601_v51, 1  ;;  %v2290_v57 = vld [vmem:[%s3753_s3] ss:$0 sm:$0xff] }
 0x1b5   :  { %v1556_v54 = vmul.f32 0.010204081, %v1554_v29  ;;  %v1603_v5 = vadd.f32 %v1602_v35, %v1601_v51 }
 0x1b7   :  { %v1604_v28 = vmul.f32 0.010204081, %v1603_v5  ;;  %v1605_v48 = vmul.f32 %v1556_v54, %v1556_v54  ;;  %v1607_v27 = vsub.f32 %v3547_v11, %v1556_v54  ;;  %v1608_v7 = vsub.f32 %v3557_v25, %v1556_v54 }
 0x1b8   :  { %v1609_v41 = vsub.f32 %v3570_v14, %v1556_v54  ;;  %v1610_v4 = vsub.f32 %v3578_v31, %v1556_v54  ;;  %v1611_v30 = vsub.f32 %v3586_v2, %v1556_v54  ;;  %v1612_v49 = vsub.f32 %v3594_v52, %v1556_v54 }
 0x1b9   :  { %v1606_v47 = vsub.f32 %v1604_v28, %v1605_v48  ;;  %v1613_v43 = vsub.f32 %v3602_v33, %v1556_v54  ;;  %v1614_v39 = vsub.f32 %v3610_v13, %v1556_v54  ;;  %v1615_v46 = vsub.f32 %v3618_v6, %v1556_v54 }
 0x1ba   :  { %v1616_v16 = vsub.f32 %v3626_v55, %v1556_v54  ;;  %v1617_v11 = vsub.f32 %v3634_v8, %v1556_v54  ;;  %v1618_v25 = vsub.f32 %v3644_v44, %v1556_v54  ;;  %v1619_v14 = vsub.f32 %v3653_v58, %v1556_v54  ;;  %v2289_v55 = vld [vmem:[%s3752_s2] ss:$0 sm:$0xff] }
 0x1bb   :  { %v1620_v31 = vsub.f32 %v1518_v17, %v1556_v54  ;;  %v1621_v22 = vadd.f32 1e-05, %v1606_v47  ;;  %v1693_v2 = vlaneseq }
 0x1bd   :  { %2391 = vrsqrt.f32 %v1621_v22  ;;  %v1694_v52 = vshrl.u32 %v1693_v2, 7 }
 0x1bf   :  { %v3675_v15 = vadd.s32 48, %v1694_v52 }
 0x1c1   :  { %vm1707_vm3 = vcmp.lt.s32.totalorder %v3675_v15, 49 }
 0x1ca   :  { %v2392_v36 = vpop.eup %2391 }
 0x1cb   :  { %v1623_v33 = vmul.f32 %v2392_v36, %v1607_v27  ;;  %v1624_v13 = vmul.f32 %v2392_v36, %v1608_v7  ;;  %v1625_v3 = vmul.f32 %v2392_v36, %v1609_v41  ;;  %v1626_v6 = vmul.f32 %v2392_v36, %v1610_v4 }
 0x1cc   :  { %v1627_v8 = vmul.f32 %v2392_v36, %v1611_v30  ;;  %v1628_v44 = vmul.f32 %v2392_v36, %v1612_v49  ;;  %v1629_v63 = vmul.f32 %v2392_v36, %v1613_v43  ;;  %v1630_v58 = vmul.f32 %v2392_v36, %v1614_v39 }
 0x1cd   :  { %v1631_v17 = vmul.f32 %v2392_v36, %v1615_v46  ;;  %v1632_v59 = vmul.f32 %v2392_v36, %v1616_v16  ;;  %v1633_v34 = vmul.f32 %v2392_v36, %v1617_v11  ;;  %v1634_v50 = vmul.f32 %v2392_v36, %v1618_v25 }
 0x1ce   :  { %v1635_v38 = vmul.f32 %v2392_v36, %v1619_v14  ;;  %v1636_v23 = vmul.f32 %v2392_v36, %v1620_v31  ;;  %v1644_v20 = vmul.f32 %v2289_v55, %v1623_v33  ;;  %v1645_v37 = vmul.f32 %v2289_v55, %v1624_v13 }
 0x1cf   :  { %v1646_v61 = vmul.f32 %v2289_v55, %v1625_v3  ;;  %v1647_v10 = vmul.f32 %v2289_v55, %v1626_v6  ;;  %v1648_v40 = vmul.f32 %v2289_v55, %v1627_v8  ;;  %v1649_v56 = vmul.f32 %v2289_v55, %v1628_v44 }
 0x1d0   :  { %v1650_v21 = vmul.f32 %v2289_v55, %v1629_v63  ;;  %v1651_v26 = vmul.f32 %v2289_v55, %v1630_v58  ;;  %v1652_v51 = vmul.f32 %v2289_v55, %v1631_v17  ;;  %v1653_v29 = vmul.f32 %v2289_v55, %v1632_v59 }
 0x1d1   :  { %v1654_v35 = vmul.f32 %v2289_v55, %v1633_v34  ;;  %v1655_v54 = vmul.f32 %v2289_v55, %v1634_v50  ;;  %v1656_v5 = vmul.f32 %v2289_v55, %v1635_v38  ;;  %v1657_v28 = vmul.f32 %v2289_v55, %v1636_v23 }
 0x1d2   :  { %v1665_v48 = vadd.f32 %v2290_v57, %v1644_v20  ;;  %v1666_v27 = vadd.f32 %v2290_v57, %v1645_v37  ;;  %v1667_v7 = vadd.f32 %v2290_v57, %v1646_v61  ;;  %v1668_v41 = vadd.f32 %v2290_v57, %v1647_v10 }
 0x1d3   :  { %v1669_v4 = vadd.f32 %v2290_v57, %v1648_v40  ;;  %v1670_v30 = vadd.f32 %v2290_v57, %v1649_v56  ;;  %v1671_v49 = vadd.f32 %v2290_v57, %v1650_v21  ;;  %v1672_v47 = vadd.f32 %v2290_v57, %v1651_v26 }
 0x1d4   :  { %v1673_v43 = vadd.f32 %v2290_v57, %v1652_v51  ;;  %v1674_v39 = vadd.f32 %v2290_v57, %v1653_v29  ;;  %v1675_v46 = vadd.f32 %v2290_v57, %v1654_v35  ;;  %v1676_v16 = vadd.f32 %v2290_v57, %v1655_v54 }
 0x1d5   :  { %v1677_v11 = vadd.f32 %v2290_v57, %v1656_v5  ;;  %v1678_v25 = vadd.f32 %v2290_v57, %v1657_v28  ;;  %v1679_v14 = vmax.f32 %v1665_v48, 0.0  ;;  %v1680_v31 = vmax.f32 %v1666_v27, 0.0 }
 0x1d6   :  { %v1681_v22 = vmax.f32 %v1667_v7, 0.0  ;;  %v1682_v2 = vmax.f32 %v1668_v41, 0.0  ;;  %v1683_v52 = vmax.f32 %v1669_v4, 0.0  ;;  %v1684_v36 = vmax.f32 %v1670_v30, 0.0 }
 0x1d7   :  { %v1685_v33 = vmax.f32 %v1671_v49, 0.0  ;;  %v1686_v13 = vmax.f32 %v1672_v47, 0.0  ;;  %v1687_v3 = vmax.f32 %v1673_v43, 0.0  ;;  %v1688_v6 = vmax.f32 %v1674_v39, 0.0 }
 0x1d8   :  { %v1689_v55 = vmax.f32 %v1675_v46, 0.0  ;;  %v1690_v8 = vmax.f32 %v1676_v16, 0.0  ;;  %v1692_v44 = vmax.f32 %v1678_v25, 0.0  ;;  %v1691_v63 = vmax.f32 %v1677_v11, 0.0 }
 0x1d9   :  { %v1722_v58 = vsel %vm1521_vm2, %v1679_v14, -inf  ;;  %v1723_v17 = vsel %vm1521_vm2, %v1680_v31, -inf  ;;  %v1724_v59 = vsel %vm1521_vm2, %v1681_v22, -inf  ;;  %v1714_v34 = vsel %vm1707_vm3, %v1685_v33, 0.0 }
 0x1da   :  { %v1721_v50 = vsel %vm1707_vm3, %v1692_v44, 0.0  ;;  %v1725_v38 = vmax.f32 %v1722_v58, %v1724_v59  ;;  %v1726_v15 = vsel %vm1521_vm2, %v1682_v2, -inf  ;;  %v1728_v20 = vsel %vm1521_vm2, %v1683_v52, -inf }
 0x1db   :  { %v1727_v23 = vmax.f32 %v1723_v17, %v1726_v15  ;;  %v1730_v37 = vsel %vm1521_vm2, %v1684_v36, -inf  ;;  %v1741_v61 = vsel %vm1521_vm2, %v1686_v13, -inf  ;;  %v1742_v40 = vsel %vm1521_vm2, %v1687_v3, -inf }
 0x1dc   :  { %v1729_v10 = vmax.f32 %v1725_v38, %v1728_v20  ;;  %v1743_v56 = vsel %vm1521_vm2, %v1688_v6, -inf  ;;  %v1745_v57 = vsel %vm1521_vm2, %v1689_v55, -inf  ;;  %v1732_v26 = vsel %vm1521_vm2, %v1714_v34, -inf }
 0x1dd   :  { %v1731_v21 = vmax.f32 %v1727_v23, %v1730_v37  ;;  %v1744_v51 = vmax.f32 %v1741_v61, %v1743_v56  ;;  %v1746_v29 = vmax.f32 %v1742_v40, %v1745_v57  ;;  %v1747_v54 = vsel %vm1521_vm2, %v1690_v8, -inf }
 0x1de   :  { %v1733_v35 = vmax.f32 %v1729_v10, %v1732_v26  ;;  %v1749_v5 = vsel %vm1521_vm2, %v1691_v63, -inf  ;;  %v1751_v7 = vsel %vm1521_vm2, %v1721_v50, -inf }
 0x1df   :  { %v1748_v28 = vmax.f32 %v1744_v51, %v1747_v54  ;;  %v1750_v48 = vmax.f32 %v1746_v29, %v1749_v5 }
 0x1e0   :  { %v1734_v27 = vmax.f32 %v1733_v35, %v1731_v21 }
 0x1e1   :  { %v1752_v41 = vmax.f32 %v1748_v28, %v1751_v7 }
 0x1e2   :  { %v1735_v4 = vrot.slane %v1734_v27, 4 }
 0x1e3   :  { %v1753_v30 = vmax.f32 %v1752_v41, %v1750_v48 }
 0x1e4   :  { %v1736_v49 = vmax.f32 %v1734_v27, %v1735_v4 }
 0x1e5   :  { %v1754_v47 = vrot.slane %v1753_v30, 4 }
 0x1e6   :  { %v1737_v43 = vrot.slane %v1736_v49, 2 }
 0x1e7   :  { %v1755_v39 = vmax.f32 %v1753_v30, %v1754_v47 }
 0x1e8   :  { %v1738_v46 = vmax.f32 %v1736_v49, %v1737_v43 }
 0x1e9   :  { %v1756_v16 = vrot.slane %v1755_v39, 2 }
 0x1ea   :  { %v1739_v11 = vrot.slane %v1738_v46, 1 }
 0x1eb   :  { %v1757_v25 = vmax.f32 %v1755_v39, %v1756_v16 }
 0x1ec   :  { %v1740_v14 = vmax.f32 %v1738_v46, %v1739_v11 }
 0x1ed   :  { %v1758_v31 = vrot.slane %v1757_v25, 1 }
 0x1ef   :  { %v1759_v22 = vmax.f32 %v1757_v25, %v1758_v31 }
 0x1f1   :  { %v1774_v2 = vsel %vm1773_vm4, %v1759_v22, %v1740_v14 }
 0x1f2   :  { %v1775_v52 = vsel %vm1521_vm2, %v1774_v2, 0 }
 0x1f3   :  { %v1846_v36 = vand.u32 4294901760, %v1775_v52 }
 0x1f5   :  { %2342 = vmatmul.mubr.f32.vlgmr.msra.gmra.mxu1 %v1846_v36  ;;  %v1847_v33 = vsub.f32 %v1775_v52, %v1846_v36 }
 0x1f6   :  { %2356 = vmatpush3.msra.mxu1 %v3488_v53  ;;  %2363 = vmatprep.mubr.msk.f32.mxu1 %vm2420_vm1, %v3898_v32 }
 0x1f7   :  { %2357 = vmatprep.subr.mxu1 %v3898_v32  ;;  %v1848_v13 = vand.u32 4294901760, %v1847_v33 }
 0x1f8   :  { %2358 = vmatpush3.msra.mxu1 %v3499_v19 }
 0x1f9   :  { %2359 = vmatprep.subr.mxu1 %v3898_v32  ;;  %v1849_v3 = vsub.f32 %v1847_v33, %v1848_v13 }
 0x1fa   :  { %2360 = vmatpush3.msra.mxu1 %v3510_v60 }
 0x1fb   :  { %2361 = vmatprep.subr.mxu1 %v3898_v32  ;;  %v1850_v6 = vand.u32 4294901760, %v1849_v3 }
 0x1fc   :  { %2362 = vmatpush3.msra.mxu1 %v3516_v45 }
 0x1fd   :  { %2364 = vmatmul.mubr.f32.vlgmr.msra.gmra.mxu1 %v1848_v13  ;;  %2377 = vmatprep.subr.mxu1 %v3898_v32 }
 0x1fe   :  { %2331 = vmatmul.mubr.f32.vlgmr.msra.gmra.mxu0 %v1850_v6  ;;  %2378 = vmatpush3.msra.mxu1 %v3488_v53 }
 0x1ff   :  { %2345 = vmatpush3.msra.mxu0 %v3497_v12  ;;  %2379 = vmatprep.subr.mxu1 %v3898_v32 }
 0x200   :  { %2346 = vmatprep.subr.mxu0 %v3898_v32  ;;  %2380 = vmatpush3.msra.mxu1 %v3499_v19 }
 0x201   :  { %2347 = vmatpush3.msra.mxu0 %v3508_v0  ;;  %2381 = vmatprep.subr.mxu1 %v3898_v32  ;;  %v2291_v0 = vld [vmem:[%s3755_s5] ss:$0 sm:$0xff]  ;;  %s2421_s5 = smov [#allocation2]  }
 0x202   :  { %2348 = vmatprep.subr.mxu0 %v3898_v32  ;;  %2382 = vmatpush3.msra.mxu1 %v3510_v60  ;;  %s2281_s24 = sshll.u32 %s2421_s5, 4  ;;  %s2282_s24 = int_to_ptr.vmem [resolvable:$true] %s2281_s24 }
 0x203   :  { %2349 = vmatpush3.msra.mxu0 %v3526_v24  ;;  %2383 = vmatprep.subr.mxu1 %v3898_v32  ;;  %s2397_s25 = scalar_lea.vmem %s2282_s24, 32  ;;  %p2402_p1 = scmp.lt.s32.totalorder %s2282_s24, %s2282_s24 }
 0x204   :  { %2350 = vmatprep.subr.mxu0 %v3898_v32  ;;  %2352 = vmatprep.mubr.msk.f32.mxu0 %vm2420_vm1, %v3898_v32  ;;  %p2398_p0 = scmp.ne.s32.totalorder %s2282_s24, %s2397_s25  ;;  %p2403_p2 = scmp.lt.s32.totalorder %s2397_s25, %s2397_s25 }
 0x205   :  { %2351 = vmatpush3.msra.mxu0 %v3532_v18  ;;  %2384 = vmatpush3.msra.mxu1 %v3516_v45 }
 0x206   :  { %2385 = vmatprep.mubr.msk.f32.mxu1 %vm2420_vm1, %v3898_v32  ;;  %2353 = vmatmul.mubr.f32.vlgmr.msra.gmra.mxu0 %v1847_v33  ;;  %p2404_p3 = por %p2403_p2, %p2402_p1 }
 0x207   :  { %2366 = vmatprep.subr.mxu0 %v3898_v32  ;;  %2386 = vmatmul.mubr.f32.vlgmr.msra.gmra.mxu1 %v1846_v36 }
 0x208   :  { %2367 = vmatpush3.msra.mxu0 %v1883_v1  ;;  %2374 = vmatprep.mubr.msk.f32.mxu0 %vm2420_vm1, %v3898_v32  ;;  %p2405_p4 = pnand %p2404_p3, %p2398_p0 }
 0x209   :  { %2368 = vmatprep.subr.mxu0 %v3898_v32 }
 0x20a   :  { %2369 = vmatpush3.msra.mxu0 %v1890_v42 }
 0x20b   :  { %2370 = vmatprep.subr.mxu0 %v3898_v32 }
 0x20c   :  { %2371 = vmatpush3.msra.mxu0 %v1897_v62 }
 0x20d   :  { %2372 = vmatprep.subr.mxu0 %v3898_v32 }
 0x20e   :  { %2373 = vmatpush3.msra.mxu0 %v1904_v9 }
 0x20f   :  { %2375 = vmatmul.mubr.f32.vlgmr.msra.gmra.mxu0 %v1846_v36 }
 0x2b5   :  { %v1943_v53 = vpop.f32.mrf.mxu1 }
 0x2b7   :  { %v2343_v12 = vpop.f32.mrf.mxu1 }
 0x2bd   :  { %v2100_v19 = vpop.f32.mrf.mxu1 }
 0x2be   :  { %v1852_v1 = vpop.f32.mrf.mxu0 }
 0x2bf   :  { %v2365_v60 = vpop.f32.mrf.mxu1  ;;  %v1853_v42 = vadd.f32 %v2291_v0, %v1852_v1 }
 0x2c0   :  { %v2332_v45 = vpop.f32.mrf.mxu0 }
 0x2c1   :  { %v1944_v62 = vadd.f32 %v1943_v53, %v1853_v42 }
 0x2c6   :  { %v2023_v55 = vpop.f32.mrf.mxu0 }
 0x2c7   :  { %v2258_v24 = vpop.f32.mrf.mxu1  ;;  %v2024_v44 = vadd.f32 %v2023_v55, %v1944_v62 }
 0x2c8   :  { %v2354_v8 = vpop.f32.mrf.mxu0 }
 0x2c9   :  { %v2387_v32 = vpop.f32.mrf.mxu1  ;;  %v2101_v18 = vadd.f32 %v2100_v19, %v2024_v44 }
 0x2cf   :  { %v2183_v9 = vpop.f32.mrf.mxu0 }
 0x2d0   :  { %v2184_v63 = vadd.f32 %v2183_v9, %v2101_v18 }
 0x2d1   :  { %v2376_v58 = vpop.f32.mrf.mxu0 }
 0x2d2   :  { %v2259_v17 = vadd.f32 %v2258_v24, %v2184_v63 }
 0x2d4   :  { %v2263_v59 = vsel %vm2262_vm5, %v2259_v17, -inf }
 0x2d5   :  { %2264 = vmax.xlane.f32.xlu0 %v2263_v59 }
 0x35e   :  { %v2265_v34 = vpop.xlane.xlu0 %2264 }
 0x35f   :  { %v2266_v50 = vsub.f32 %v2259_v17, %v2265_v34 }
 0x361   :  { %v2267_v38 = vmul.f32 1.442695, %v2266_v50 }
 0x363   :  { %2393 = vpow2.f32 %v2267_v38 }
 0x370   :  { %v2394_v15 = vpop.eup %2393 }
 0x371   :  { %v2269_v23 = vsel %vm2262_vm5, %v2394_v15, 0.0 }
 0x372   :  { %2270 = vadd.xlane.f32.xlu0 %v2269_v23 }
 0x3fb   :  { %v2271_v20 = vpop.xlane.xlu0 %2270 }
 0x3fc   :  { %2395 = vrcp.f32 %v2271_v20 }
 0x409   :  { %v2396_v37 = vpop.eup %2395 }
 0x40a   :  { %v2273_v61 = vmul.f32 %v2396_v37, %v2394_v15 }
 0x40c   :  { %2274 = vst.msk [vmem:[#allocation2] sm:$0x3] %vm2262_vm5, %v2273_v61 }
 0x40d   :  { %2408 = shalt.err (!%p2405_p4)
}
 0x40e   :  { %2284 = dma.vmem_to_hbm [thread:$0]  %s2282_s24, 32, %s3756_s6, [#allocation3]  }
 0x40f   :  { %2417 = dma.done.wait [#allocation3], 32  }
 0x410   :  { %2418 = vsyncadd [#allocation3], 4294967264 }
 0x411   :  { %2288 = vsyncpa [#allocation3], 1 }

</bundles_post_ra>
